<compile_context>
chip_gen: v7x
topology: tpu7x:2x2x1
jax: 0.10.0
libtpu: 0.0.40
codegen_flags: <defaults>
</compile_context>

<pallas_src>
import functools

import jax
import jax.numpy as jnp
from jax.experimental import pallas as pl
from jax.experimental.pallas import tpu as pltpu

IN_FEATURES = 28 * 28   # 784
K_PAD = 896             # 784 padded up to a multiple of 128
HIDDEN = 512
OUT_FEATURES = 10
OUT_PAD = 128           # 10 padded up to a lane-dense 128


def mlp_kernel(x_ref, w1_ref, b1_ref, w2_ref, b2_ref, w3_ref, b3_ref, o_ref):
    # x_ref : (tm, 896)  bf16      w1_ref: (896, 512) bf16   b1_ref: (1, 512) f32
    # w2_ref: (512, 512) bf16      b2_ref: (1, 512) f32
    # w3_ref: (512, 128) bf16      b3_ref: (1, 128) f32      o_ref : (tm, 128) f32
    x = x_ref[...]
    h1 = jnp.dot(x, w1_ref[...], preferred_element_type=jnp.float32) + b1_ref[...]
    h1 = jnp.maximum(h1, 0.0).astype(jnp.bfloat16)          # ReLU (VPU) + bf16 for MXU
    h2 = jnp.dot(h1, w2_ref[...], preferred_element_type=jnp.float32) + b2_ref[...]
    h2 = jnp.maximum(h2, 0.0).astype(jnp.bfloat16)
    logits = jnp.dot(h2, w3_ref[...], preferred_element_type=jnp.float32) + b3_ref[...]
    o_ref[...] = logits.astype(o_ref.dtype)


def prepare_params(params):
    """One-time conversion: PyTorch (out,in) f32 -> padded (in,out) bf16 + f32 biases."""
    w1, b1, w2, b2, w3, b3 = params

    w1p = jnp.zeros((K_PAD, HIDDEN), jnp.float32).at[:IN_FEATURES, :].set(w1.T)
    w2p = w2.T                                                    # (512, 512)
    w3p = jnp.zeros((HIDDEN, OUT_PAD), jnp.float32).at[:, :OUT_FEATURES].set(w3.T)

    b1p = b1.reshape(1, HIDDEN).astype(jnp.float32)
    b2p = b2.reshape(1, HIDDEN).astype(jnp.float32)
    b3p = jnp.zeros((1, OUT_PAD), jnp.float32).at[:, :OUT_FEATURES].set(
        b3.reshape(1, OUT_FEATURES))

    return (w1p.astype(jnp.bfloat16), b1p,
            w2p.astype(jnp.bfloat16), b2p,
            w3p.astype(jnp.bfloat16), b3p)


@functools.partial(jax.jit, static_argnames=("tm",))
def neural_network_forward(x_nchw, prepared, tm=128):
    """x_nchw: (B, 1, 28, 28) float32. Returns logits (B, 10) float32."""
    w1p, b1p, w2p, b2p, w3p, b3p = prepared
    B = x_nchw.shape[0]

    # nn.Flatten(): flatten all dims except batch -> (B, 784); pad to lane-dense
    # (Bp, 896) bf16 with zeros (zeros in padded K rows/cols contribute nothing).
    x2d = x_nchw.reshape(B, -1)
    Bp = pl.cdiv(B, tm) * tm
    x_pad = jnp.zeros((Bp, K_PAD), jnp.bfloat16)
    x_pad = x_pad.at[:B, :IN_FEATURES].set(x2d.astype(jnp.bfloat16))

    grid = (Bp // tm,)

    flops = 2 * Bp * (K_PAD * HIDDEN + HIDDEN * HIDDEN + HIDDEN * OUT_PAD)
    bytes_accessed = (
        x_pad.size * 2
        + w1p.size * 2 + w2p.size * 2 + w3p.size * 2
        + (b1p.size + b2p.size + b3p.size) * 4
        + Bp * OUT_PAD * 4
    )

    out = pl.pallas_call(
        mlp_kernel,
        out_shape=jax.ShapeDtypeStruct((Bp, OUT_PAD), jnp.float32),
        grid=grid,
        in_specs=[
            pl.BlockSpec((tm, K_PAD), lambda i: (i, 0)),        # x tile (pipelined)
            pl.BlockSpec((K_PAD, HIDDEN), lambda i: (0, 0)),    # w1 (resident)
            pl.BlockSpec((1, HIDDEN), lambda i: (0, 0)),        # b1 (resident)
            pl.BlockSpec((HIDDEN, HIDDEN), lambda i: (0, 0)),   # w2 (resident)
            pl.BlockSpec((1, HIDDEN), lambda i: (0, 0)),        # b2 (resident)
            pl.BlockSpec((HIDDEN, OUT_PAD), lambda i: (0, 0)),  # w3 (resident)
            pl.BlockSpec((1, OUT_PAD), lambda i: (0, 0)),       # b3 (resident)
        ],
        out_specs=pl.BlockSpec((tm, OUT_PAD), lambda i: (i, 0)),
        compiler_params=pltpu.CompilerParams(
            dimension_semantics=("parallel",),
            vmem_limit_bytes=32 * 1024 * 1024,
        ),
        cost_estimate=pl.CostEstimate(
            flops=flops, transcendentals=0, bytes_accessed=bytes_accessed),
    )(x_pad, w1p, b1p, w2p, b2p, w3p, b3p)

    return out[:B, :OUT_FEATURES]


def init_params(key):
    """Deterministic, PyTorch-like (uniform +/- 1/sqrt(fan_in)) init, (out,in) layout."""
    def linear_init(k, out_f, in_f):
        kw, kb = jax.random.split(k)
        bound = 1.0 / jnp.sqrt(in_f)
        w = jax.random.uniform(kw, (out_f, in_f), jnp.float32, -bound, bound)
        b = jax.random.uniform(kb, (out_f,), jnp.float32, -bound, bound)
        return w, b

    k1, k2, k3 = jax.random.split(key, 3)
    w1, b1 = linear_init(k1, 512, IN_FEATURES)
    w2, b2 = linear_init(k2, 512, 512)
    w3, b3 = linear_init(k3, 10, 512)
    return (w1, b1, w2, b2, w3, b3)


def reference_forward_bf16(x_nchw, params):
    """Pure-JAX reference with the same bf16-input / f32-accumulate arithmetic."""
    w1, b1, w2, b2, w3, b3 = params
    x = x_nchw.reshape(x_nchw.shape[0], -1).astype(jnp.bfloat16)
    h1 = jnp.dot(x, w1.T.astype(jnp.bfloat16),
                 preferred_element_type=jnp.float32) + b1
    h1 = jnp.maximum(h1, 0.0).astype(jnp.bfloat16)
    h2 = jnp.dot(h1, w2.T.astype(jnp.bfloat16),
                 preferred_element_type=jnp.float32) + b2
    h2 = jnp.maximum(h2, 0.0).astype(jnp.bfloat16)
    return jnp.dot(h2, w3.T.astype(jnp.bfloat16),
                   preferred_element_type=jnp.float32) + b3


def reference_forward_f32(x_nchw, params):
    w1, b1, w2, b2, w3, b3 = params
    x = x_nchw.reshape(x_nchw.shape[0], -1)
    h1 = jnp.maximum(x @ w1.T + b1, 0.0)
    h2 = jnp.maximum(h1 @ w2.T + b2, 0.0)
    return h2 @ w3.T + b3


if __name__ == "__main__":
    key = jax.random.PRNGKey(0)
    kx, kp = jax.random.split(key)

    B = 8  # MNIST images are (1, 28, 28)
    x = jax.random.normal(kx, (B, 1, 28, 28), dtype=jnp.float32)
    params = init_params(kp)
    prepared = prepare_params(params)   # one-time: transpose + pad + bf16 cast

    logits = neural_network_forward(x, prepared)
    logits = jax.block_until_ready(logits)
    assert logits.shape == (B, 10)

    # Bitwise-comparable bf16 reference (tight-ish) + loose check vs full f32.
    ref_bf16 = reference_forward_bf16(x, params)
    ref_f32 = reference_forward_f32(x, params)
    assert jnp.allclose(logits, ref_bf16, atol=1e-2, rtol=1e-2)
    assert jnp.allclose(logits, ref_f32, atol=5e-2)

    print("KERNEL_OK")
</pallas_src>

<mosaic_0001>
module attributes {stable_mosaic.version = 11 : i64} {
  func.func @mlp_kernel(%arg0: i32, %arg1: memref<128x896xbf16, #tpu.memory_space<vmem>>, %arg2: memref<896x512xbf16, #tpu.memory_space<vmem>>, %arg3: memref<1x512xf32, #tpu.memory_space<vmem>>, %arg4: memref<512x512xbf16, #tpu.memory_space<vmem>>, %arg5: memref<1x512xf32, #tpu.memory_space<vmem>>, %arg6: memref<512x128xbf16, #tpu.memory_space<vmem>>, %arg7: memref<1x128xf32, #tpu.memory_space<vmem>>, %arg8: memref<128x128xf32, #tpu.memory_space<vmem>>) attributes {dimension_semantics = [#tpu.dimension_semantics<parallel>], iteration_bounds = array<i64: 1>, scalar_prefetch = 0 : i64, scratch_operands = 0 : i64, tpu.core_type = #tpu.core_type<tc>, window_params = [{transform_indices = @transform_0, window_bounds = array<i64: 128, 896>}, {pipeline_mode = #tpu.pipeline_mode<synchronous>, transform_indices = @transform_1, window_bounds = array<i64: 896, 512>}, {pipeline_mode = #tpu.pipeline_mode<synchronous>, transform_indices = @transform_2, window_bounds = array<i64: 1, 512>}, {pipeline_mode = #tpu.pipeline_mode<synchronous>, transform_indices = @transform_3, window_bounds = array<i64: 512, 512>}, {pipeline_mode = #tpu.pipeline_mode<synchronous>, transform_indices = @transform_4, window_bounds = array<i64: 1, 512>}, {pipeline_mode = #tpu.pipeline_mode<synchronous>, transform_indices = @transform_5, window_bounds = array<i64: 512, 128>}, {pipeline_mode = #tpu.pipeline_mode<synchronous>, transform_indices = @transform_6, window_bounds = array<i64: 1, 128>}, {transform_indices = @transform_7, window_bounds = array<i64: 128, 128>}]} {
    %c0 = arith.constant 0 : index
    %c0_0 = arith.constant 0 : index
    %0 = vector.load %arg1[%c0, %c0_0] : memref<128x896xbf16, #tpu.memory_space<vmem>>, vector<128x896xbf16>
    %c0_1 = arith.constant 0 : index
    %c0_2 = arith.constant 0 : index
    %1 = vector.load %arg2[%c0_1, %c0_2] : memref<896x512xbf16, #tpu.memory_space<vmem>>, vector<896x512xbf16>
    %cst = arith.constant dense<0.000000e+00> : vector<128x512xf32>
    %2 = tpu.matmul %0, %1, %cst {dimension_numbers = #tpu.dot_dimension_numbers<[1], [0], [0], [1], [0, 0, 1, 1], [], []>} : vector<128x896xbf16>, vector<896x512xbf16>, vector<128x512xf32> -> vector<128x512xf32>
    %c0_3 = arith.constant 0 : index
    %c0_4 = arith.constant 0 : index
    %3 = vector.load %arg3[%c0_3, %c0_4] : memref<1x512xf32, #tpu.memory_space<vmem>>, vector<1x512xf32>
    %4 = vector.broadcast %3 : vector<1x512xf32> to vector<128x512xf32>
    %5 = arith.addf %2, %4 : vector<128x512xf32>
    %cst_5 = arith.constant 0.000000e+00 : f32
    %6 = vector.broadcast %cst_5 : f32 to vector<128x512xf32>
    %7 = arith.maximumf %5, %6 : vector<128x512xf32>
    %8 = arith.truncf %7 : vector<128x512xf32> to vector<128x512xbf16>
    %c0_6 = arith.constant 0 : index
    %c0_7 = arith.constant 0 : index
    %9 = vector.load %arg4[%c0_6, %c0_7] : memref<512x512xbf16, #tpu.memory_space<vmem>>, vector<512x512xbf16>
    %cst_8 = arith.constant dense<0.000000e+00> : vector<128x512xf32>
    %10 = tpu.matmul %8, %9, %cst_8 {dimension_numbers = #tpu.dot_dimension_numbers<[1], [0], [0], [1], [0, 0, 1, 1], [], []>} : vector<128x512xbf16>, vector<512x512xbf16>, vector<128x512xf32> -> vector<128x512xf32>
    %c0_9 = arith.constant 0 : index
    %c0_10 = arith.constant 0 : index
    %11 = vector.load %arg5[%c0_9, %c0_10] : memref<1x512xf32, #tpu.memory_space<vmem>>, vector<1x512xf32>
    %12 = vector.broadcast %11 : vector<1x512xf32> to vector<128x512xf32>
    %13 = arith.addf %10, %12 : vector<128x512xf32>
    %cst_11 = arith.constant 0.000000e+00 : f32
    %14 = vector.broadcast %cst_11 : f32 to vector<128x512xf32>
    %15 = arith.maximumf %13, %14 : vector<128x512xf32>
    %16 = arith.truncf %15 : vector<128x512xf32> to vector<128x512xbf16>
    %c0_12 = arith.constant 0 : index
    %c0_13 = arith.constant 0 : index
    %17 = vector.load %arg6[%c0_12, %c0_13] : memref<512x128xbf16, #tpu.memory_space<vmem>>, vector<512x128xbf16>
    %cst_14 = arith.constant dense<0.000000e+00> : vector<128x128xf32>
    %18 = tpu.matmul %16, %17, %cst_14 {dimension_numbers = #tpu.dot_dimension_numbers<[1], [0], [0], [1], [0, 0, 1, 1], [], []>} : vector<128x512xbf16>, vector<512x128xbf16>, vector<128x128xf32> -> vector<128x128xf32>
    %c0_15 = arith.constant 0 : index
    %c0_16 = arith.constant 0 : index
    %19 = vector.load %arg7[%c0_15, %c0_16] : memref<1x128xf32, #tpu.memory_space<vmem>>, vector<1x128xf32>
    %20 = vector.broadcast %19 : vector<1x128xf32> to vector<128x128xf32>
    %21 = arith.addf %18, %20 : vector<128x128xf32>
    %c0_17 = arith.constant 0 : index
    %c0_18 = arith.constant 0 : index
    %22 = vector.load %arg8[%c0_17, %c0_18] : memref<128x128xf32, #tpu.memory_space<vmem>>, vector<128x128xf32>
    tpu.vector_store %arg8[%c0_17, %c0_18], %21 {strides = array<i32>} : memref<128x128xf32, #tpu.memory_space<vmem>>, vector<128x128xf32>,
    return
  }
  func.func @transform_0(%arg0: i32) -> (i32, i32) {
    %c0_i32 = arith.constant 0 : i32
    %c0_i32_0 = arith.constant 0 : i32
    return %arg0, %c0_i32 : i32, i32
  }
  func.func @transform_1(%arg0: i32) -> (i32, i32) {
    %c0_i32 = arith.constant 0 : i32
    %c0_i32_0 = arith.constant 0 : i32
    %c0_i32_1 = arith.constant 0 : i32
    return %c0_i32, %c0_i32_0 : i32, i32
  }
  func.func @transform_2(%arg0: i32) -> (i32, i32) {
    %c0_i32 = arith.constant 0 : i32
    %c0_i32_0 = arith.constant 0 : i32
    %c0_i32_1 = arith.constant 0 : i32
    return %c0_i32, %c0_i32_0 : i32, i32
  }
  func.func @transform_3(%arg0: i32) -> (i32, i32) {
    %c0_i32 = arith.constant 0 : i32
    %c0_i32_0 = arith.constant 0 : i32
    %c0_i32_1 = arith.constant 0 : i32
    return %c0_i32, %c0_i32_0 : i32, i32
  }
  func.func @transform_4(%arg0: i32) -> (i32, i32) {
    %c0_i32 = arith.constant 0 : i32
    %c0_i32_0 = arith.constant 0 : i32
    %c0_i32_1 = arith.constant 0 : i32
    return %c0_i32, %c0_i32_0 : i32, i32
  }
  func.func @transform_5(%arg0: i32) -> (i32, i32) {
    %c0_i32 = arith.constant 0 : i32
    %c0_i32_0 = arith.constant 0 : i32
    %c0_i32_1 = arith.constant 0 : i32
    return %c0_i32, %c0_i32_0 : i32, i32
  }
  func.func @transform_6(%arg0: i32) -> (i32, i32) {
    %c0_i32 = arith.constant 0 : i32
    %c0_i32_0 = arith.constant 0 : i32
    %c0_i32_1 = arith.constant 0 : i32
    return %c0_i32, %c0_i32_0 : i32, i32
  }
  func.func @transform_7(%arg0: i32) -> (i32, i32) {
    %c0_i32 = arith.constant 0 : i32
    %c0_i32_0 = arith.constant 0 : i32
    return %arg0, %c0_i32 : i32, i32
  }
}

</mosaic_0001>

<bundles_post_ra>
// kernel: neural_network_forward.1
= control target key start
LH: loop header
LB: loop body
LE: loop exit
PB: predicated region body
PF: predicated region fallthrough
CT: control target
= control target key end

     0   :  { %12 = vsyncpa [#allocation3], 0  ;;  %s6890_s0 = inlined_call_operand.vmem [shape: bf16[128,896], index: 0, kind: input, shape index: {}]   ;;  %s6891_s1 = inlined_call_operand.hbm [shape: bf16[896,512], index: 1, kind: input, shape index: {}]   ;;  %s6892_s2 = inlined_call_operand.vmem [shape: f32[1,512], index: 2, kind: input, shape index: {}]   ;;  %s6893_s3 = inlined_call_operand.hbm [shape: bf16[512,512], index: 3, kind: input, shape index: {}]   ;;  %s6894_s4 = inlined_call_operand.vmem [shape: f32[1,512], index: 4, kind: input, shape index: {}]   ;;  %s6895_s5 = inlined_call_operand.vmem [shape: bf16[512,128], index: 5, kind: input, shape index: {}]   ;;  %s6896_s6 = inlined_call_operand.vmem [shape: f32[1,128], index: 6, kind: input, shape index: {}]   ;;  %s6897_s7 = inlined_call_operand.vmem [shape: f32[128,128], index: 7, kind: output, shape index: {}]  }
   0x1   :  { %13 = vsyncpa [#allocation5], 0  ;;  %s6236_s24 = smov [#allocation2]   ;;  %s6188_s28 = scalar_lea.hbm %s6891_s1, 28672 }
   0x2   :  { %s21_s25 = sshll.u32 %s6236_s24, 4  ;;  %p6189_p0 = scmp.ne.s32.totalorder %s6891_s1, %s6188_s28  ;;  %s22_s25 = int_to_ptr.vmem [resolvable:$true] %s21_s25 }
   0x3   :  { %p6192_p1 = scmp.lt.u32.totalorder %s6188_s28, %s6891_s1 }
   0x5   :  { %p6194_p2 = pnand %p6192_p1, %p6189_p0 }
   0x7   :  { %6197 = shalt.err (!%p6194_p2)
}
   0x8   :  { %s6198_s10 = scalar_lea.vmem %s22_s25, 28672  ;;  %p6203_p4 = scmp.lt.s32.totalorder %s22_s25, %s22_s25 }
   0x9   :  { %p6199_p3 = scmp.ne.s32.totalorder %s22_s25, %s6198_s10  ;;  %p6204_p5 = scmp.lt.s32.totalorder %s6198_s10, %s6198_s10 }
   0xb   :  { %p6205_p6 = por %p6204_p5, %p6203_p4 }
   0xd   :  { %p6206_p7 = pnand %p6205_p6, %p6199_p3 }
   0xf   :  { %6209 = shalt.err (!%p6206_p7)
}
  0x10   :  { %s6237_s11 = smov 256   ;;  %s6238_s12 = smov 16  }
  0x11   :  { %27 = dma.hbm_to_vmem [thread:$0]  %s6891_s1, 28672, %s22_s25, [#allocation3], %s6237_s11, %s6237_s11, %s6238_s12  }
  0x12   :  { %s6239_s15 = smov [#allocation4]   ;;  %s6210_s19 = scalar_lea.hbm %s6893_s3, 16384 }
  0x13   :  { %s35_s16 = sshll.u32 %s6239_s15, 4  ;;  %p6211_p8 = scmp.ne.s32.totalorder %s6893_s3, %s6210_s19  ;;  %s36_s16 = int_to_ptr.vmem [resolvable:$true] %s35_s16 }
  0x14   :  { %p6214_p9 = scmp.lt.u32.totalorder %s6210_s19, %s6893_s3 }
  0x16   :  { %p6216_p10 = pnand %p6214_p9, %p6211_p8 }
  0x18   :  { %6219 = shalt.err (!%p6216_p10)
}
  0x19   :  { %s6220_s24 = scalar_lea.vmem %s36_s16, 16384  ;;  %p6225_p12 = scmp.lt.s32.totalorder %s36_s16, %s36_s16 }
  0x1a   :  { %p6221_p11 = scmp.ne.s32.totalorder %s36_s16, %s6220_s24  ;;  %p6226_p13 = scmp.lt.s32.totalorder %s6220_s24, %s6220_s24 }
  0x1c   :  { %p6227_p0 = por %p6226_p13, %p6225_p12 }
  0x1e   :  { %p6228_p1 = pnand %p6227_p0, %p6221_p11 }
  0x20   :  { %6231 = shalt.err (!%p6228_p1)
}
  0x21   :  { %41 = dma.hbm_to_vmem [thread:$0]  %s6893_s3, 16384, %s36_s16, [#allocation5], %s6237_s11, %s6237_s11, %s6238_s12  }
  0x22   :  { %6232 = dma.done.wait [#allocation3], 28672  }
  0x23   :  { %6233 = vsyncadd [#allocation3], 4294938624 }
  0x24   :  { %6234 = dma.done.wait [#allocation5], 16384  }
  0x25   :  { %6235 = vsyncadd [#allocation5], 4294950912  ;;  %v5548_v0 = vld [vmem:[#allocation2 + $0x4] ss:$16 sps:$4 sm:$0xff]   ;;  %v5550_v1 = vld [vmem:[#allocation2 + $0xc] ss:$16 sps:$4 sm:$0xff]  }
  0x26   :  { %1773 = vmatprep.subr.bf16.mxu0 %v5548_v0  ;;  %v5552_v2 = vld [vmem:[#allocation2] ss:$16 sps:$4 sm:$0xff]   ;;  %v5553_v3 = vld [vmem:[#allocation2 + $0x8] ss:$16 sps:$4 sm:$0xff]   ;;  %2225 = vmatprep.subr.bf16.mxu1 %v5550_v1  ;;  %v5554_v4 = vld [vmem:[#allocation2 + $0x24] ss:$16 sps:$4 sm:$0xff]  }
  0x27   :  { %1774 = vmatpush1.bf16.msra.mxu0 %v5552_v2  ;;  %2226 = vmatpush1.bf16.msra.mxu1 %v5553_v3  ;;  %v5556_v5 = vld [vmem:[#allocation2 + $0x2c] ss:$16 sps:$4 sm:$0xff]   ;;  %v5558_v6 = vld [vmem:[#allocation2 + $0x20] ss:$16 sps:$4 sm:$0xff]   ;;  %v5559_v7 = vld [vmem:[#allocation2 + $0x28] ss:$16 sps:$4 sm:$0xff]  }
  0x28   :  { %1775 = vmatprep.subr.bf16.mxu0 %v5554_v4  ;;  %2227 = vmatprep.subr.bf16.mxu1 %v5556_v5  ;;  %v5560_v8 = vld [vmem:[#allocation2 + $0x44] ss:$16 sps:$4 sm:$0xff]   ;;  %v5562_v9 = vld [vmem:[#allocation2 + $0x4c] ss:$16 sps:$4 sm:$0xff]   ;;  %v5564_v10 = vld [vmem:[#allocation2 + $0x40] ss:$16 sps:$4 sm:$0xff]  }
  0x29   :  { %v5565_v11 = vld [vmem:[#allocation2 + $0x48] ss:$16 sps:$4 sm:$0xff]   ;;  %v5566_v12 = vld [vmem:[#allocation2 + $0x64] ss:$16 sps:$4 sm:$0xff]   ;;  %v5568_v13 = vld [vmem:[#allocation2 + $0x6c] ss:$16 sps:$4 sm:$0xff]  }
  0x2a   :  { %v5570_v14 = vld [vmem:[#allocation2 + $0x60] ss:$16 sps:$4 sm:$0xff]   ;;  %v5571_v15 = vld [vmem:[#allocation2 + $0x68] ss:$16 sps:$4 sm:$0xff]   ;;  %v5572_v16 = vld [vmem:[#allocation2 + $0x84] ss:$16 sps:$4 sm:$0xff]  }
  0x2b   :  { %1776 = vmatpush1.bf16.msra.mxu0 %v5558_v6  ;;  %2228 = vmatpush1.bf16.msra.mxu1 %v5559_v7  ;;  %v5574_v17 = vld [vmem:[#allocation2 + $0x8c] ss:$16 sps:$4 sm:$0xff]   ;;  %v5576_v18 = vld [vmem:[#allocation2 + $0x80] ss:$16 sps:$4 sm:$0xff]   ;;  %v5577_v19 = vld [vmem:[#allocation2 + $0x88] ss:$16 sps:$4 sm:$0xff]  }
  0x2c   :  { %1777 = vmatprep.subr.bf16.mxu0 %v5560_v8  ;;  %2229 = vmatprep.subr.bf16.mxu1 %v5562_v9  ;;  %v5578_v20 = vld [vmem:[#allocation2 + $0xa4] ss:$16 sps:$4 sm:$0xff]   ;;  %v5580_v21 = vld [vmem:[#allocation2 + $0xac] ss:$16 sps:$4 sm:$0xff]   ;;  %v5582_v22 = vld [vmem:[#allocation2 + $0xa0] ss:$16 sps:$4 sm:$0xff]  }
  0x2d   :  { %v5583_v23 = vld [vmem:[#allocation2 + $0xa8] ss:$16 sps:$4 sm:$0xff]   ;;  %v5584_v24 = vld [vmem:[#allocation2 + $0xc4] ss:$16 sps:$4 sm:$0xff]   ;;  %v5586_v25 = vld [vmem:[#allocation2 + $0xcc] ss:$16 sps:$4 sm:$0xff]  }
  0x2e   :  { %v5588_v26 = vld [vmem:[#allocation2 + $0xc0] ss:$16 sps:$4 sm:$0xff]   ;;  %v5589_v27 = vld [vmem:[#allocation2 + $0xc8] ss:$16 sps:$4 sm:$0xff]   ;;  %v5590_v28 = vld [vmem:[#allocation2 + $0xe4] ss:$16 sps:$4 sm:$0xff]  }
  0x2f   :  { %1778 = vmatpush1.bf16.msra.mxu0 %v5564_v10  ;;  %2230 = vmatpush1.bf16.msra.mxu1 %v5565_v11  ;;  %v5592_v29 = vld [vmem:[#allocation2 + $0xec] ss:$16 sps:$4 sm:$0xff]   ;;  %v5594_v30 = vld [vmem:[#allocation2 + $0xe0] ss:$16 sps:$4 sm:$0xff]   ;;  %v5595_v31 = vld [vmem:[#allocation2 + $0xe8] ss:$16 sps:$4 sm:$0xff]  }
  0x30   :  { %1779 = vmatprep.subr.bf16.mxu0 %v5566_v12  ;;  %2231 = vmatprep.subr.bf16.mxu1 %v5568_v13  ;;  %v5596_v32 = vld [vmem:[#allocation2 + $0x104] ss:$16 sps:$4 sm:$0xff]   ;;  %v5598_v33 = vld [vmem:[#allocation2 + $0x10c] ss:$16 sps:$4 sm:$0xff]   ;;  %v5600_v34 = vld [vmem:[#allocation2 + $0x100] ss:$16 sps:$4 sm:$0xff]  }
  0x31   :  { %v5601_v35 = vld [vmem:[#allocation2 + $0x108] ss:$16 sps:$4 sm:$0xff]   ;;  %v5602_v36 = vld [vmem:[#allocation2 + $0x124] ss:$16 sps:$4 sm:$0xff]   ;;  %v5604_v37 = vld [vmem:[#allocation2 + $0x12c] ss:$16 sps:$4 sm:$0xff]  }
  0x32   :  { %v5606_v38 = vld [vmem:[#allocation2 + $0x120] ss:$16 sps:$4 sm:$0xff]   ;;  %v5607_v39 = vld [vmem:[#allocation2 + $0x128] ss:$16 sps:$4 sm:$0xff]   ;;  %v5608_v40 = vld [vmem:[#allocation2 + $0x144] ss:$16 sps:$4 sm:$0xff]  }
  0x33   :  { %1780 = vmatpush1.bf16.msra.mxu0 %v5570_v14  ;;  %2232 = vmatpush1.bf16.msra.mxu1 %v5571_v15  ;;  %v5610_v41 = vld [vmem:[#allocation2 + $0x14c] ss:$16 sps:$4 sm:$0xff]   ;;  %v5612_v42 = vld [vmem:[#allocation2 + $0x140] ss:$16 sps:$4 sm:$0xff]   ;;  %v5613_v43 = vld [vmem:[#allocation2 + $0x148] ss:$16 sps:$4 sm:$0xff]  }
  0x34   :  { %1781 = vmatprep.subr.bf16.mxu0 %v5572_v16  ;;  %2233 = vmatprep.subr.bf16.mxu1 %v5574_v17  ;;  %v5614_v44 = vld [vmem:[#allocation2 + $0x164] ss:$16 sps:$4 sm:$0xff]   ;;  %v5616_v45 = vld [vmem:[#allocation2 + $0x16c] ss:$16 sps:$4 sm:$0xff]   ;;  %v5618_v46 = vld [vmem:[#allocation2 + $0x160] ss:$16 sps:$4 sm:$0xff]  }
  0x35   :  { %v5619_v47 = vld [vmem:[#allocation2 + $0x168] ss:$16 sps:$4 sm:$0xff]   ;;  %v5646_v48 = vld [vmem:[%s6890_s0 + $0x4] ss:$28 sps:$4 sm:$0xff]   ;;  %v5622_v50 = vld [vmem:[#allocation2 + $0x18c] ss:$16 sps:$4 sm:$0xff]  }
  0x36   :  { %v5620_v49 = vld [vmem:[#allocation2 + $0x184] ss:$16 sps:$4 sm:$0xff]   ;;  %1805 = vmatprep.mubr.bf16.mxu0 %v5646_v48  ;;  %2257 = vmatprep.mubr.bf16.mxu1 %v5646_v48  ;;  %v5624_v51 = vld [vmem:[#allocation2 + $0x180] ss:$16 sps:$4 sm:$0xff]   ;;  %v5625_v52 = vld [vmem:[#allocation2 + $0x188] ss:$16 sps:$4 sm:$0xff]  }
  0x37   :  { %1782 = vmatpush1.bf16.msra.mxu0 %v5576_v18  ;;  %2234 = vmatpush1.bf16.msra.mxu1 %v5577_v19  ;;  %v5626_v53 = vld [vmem:[#allocation2 + $0x1a4] ss:$16 sps:$4 sm:$0xff]   ;;  %v5628_v54 = vld [vmem:[#allocation2 + $0x1ac] ss:$16 sps:$4 sm:$0xff]   ;;  %v5630_v55 = vld [vmem:[#allocation2 + $0x1a0] ss:$16 sps:$4 sm:$0xff]  }
  0x38   :  { %1783 = vmatprep.subr.bf16.mxu0 %v5578_v20  ;;  %2235 = vmatprep.subr.bf16.mxu1 %v5580_v21  ;;  %v5631_v56 = vld [vmem:[#allocation2 + $0x1a8] ss:$16 sps:$4 sm:$0xff]   ;;  %v5632_v57 = vld [vmem:[#allocation2 + $0x1c4] ss:$16 sps:$4 sm:$0xff]   ;;  %v5634_v58 = vld [vmem:[#allocation2 + $0x1cc] ss:$16 sps:$4 sm:$0xff]  }
  0x39   :  { %v5636_v59 = vld [vmem:[#allocation2 + $0x1c0] ss:$16 sps:$4 sm:$0xff]   ;;  %v5637_v60 = vld [vmem:[#allocation2 + $0x1c8] ss:$16 sps:$4 sm:$0xff]   ;;  %v5638_v61 = vld [vmem:[#allocation2 + $0x1e4] ss:$16 sps:$4 sm:$0xff]  }
  0x3a   :  { %v5640_v62 = vld [vmem:[#allocation2 + $0x1ec] ss:$16 sps:$4 sm:$0xff]   ;;  %v5642_v63 = vld [vmem:[#allocation2 + $0x1e0] ss:$16 sps:$4 sm:$0xff]   ;;  %v5643_v0 = vld [vmem:[#allocation2 + $0x1e8] ss:$16 sps:$4 sm:$0xff]  }
  0x3b   :  { %1784 = vmatpush1.bf16.msra.mxu0 %v5582_v22  ;;  %2236 = vmatpush1.bf16.msra.mxu1 %v5583_v23  ;;  %v5649_v1 = vld [vmem:[#allocation2 + $0x204] ss:$16 sps:$4 sm:$0xff]   ;;  %v5652_v2 = vld [vmem:[#allocation2 + $0x20c] ss:$16 sps:$4 sm:$0xff]   ;;  %v5647_v4 = vld [vmem:[#allocation2 + $0x200] ss:$16 sps:$4 sm:$0xff]  }
  0x3c   :  { %1785 = vmatprep.subr.bf16.mxu0 %v5584_v24  ;;  %2237 = vmatprep.subr.bf16.mxu1 %v5586_v25  ;;  %v5644_v3 = vld [vmem:[%s6890_s0] ss:$28 sps:$4 sm:$0xff]   ;;  %v5650_v5 = vld [vmem:[#allocation2 + $0x208] ss:$16 sps:$4 sm:$0xff]   ;;  %v5655_v6 = vld [vmem:[#allocation2 + $0x224] ss:$16 sps:$4 sm:$0xff]  }
  0x3d   :  { %v5658_v7 = vld [vmem:[#allocation2 + $0x22c] ss:$16 sps:$4 sm:$0xff]   ;;  %v5653_v9 = vld [vmem:[#allocation2 + $0x220] ss:$16 sps:$4 sm:$0xff]   ;;  %v5656_v10 = vld [vmem:[#allocation2 + $0x228] ss:$16 sps:$4 sm:$0xff]  }
  0x3e   :  { %v5659_v8 = vld [vmem:[%s6890_s0 + $0x3c] ss:$28 sps:$4 sm:$0xff]   ;;  %v5664_v11 = vld [vmem:[#allocation2 + $0x244] ss:$16 sps:$4 sm:$0xff]   ;;  %v5662_v14 = vld [vmem:[#allocation2 + $0x240] ss:$16 sps:$4 sm:$0xff]  }
  0x3f   :  { %1786 = vmatpush1.bf16.msra.mxu0 %v5588_v26  ;;  %2238 = vmatpush1.bf16.msra.mxu1 %v5589_v27  ;;  %v5667_v12 = vld [vmem:[#allocation2 + $0x24c] ss:$16 sps:$4 sm:$0xff]   ;;  %v5661_v13 = vld [vmem:[%s6890_s0 + $0x38] ss:$28 sps:$4 sm:$0xff]   ;;  %v5668_v19 = vld [vmem:[#allocation2 + $0x260] ss:$16 sps:$4 sm:$0xff]  }
  0x40   :  { %1787 = vmatprep.subr.bf16.mxu0 %v5590_v28  ;;  %2239 = vmatprep.subr.bf16.mxu1 %v5592_v29  ;;  %v5665_v15 = vld [vmem:[#allocation2 + $0x248] ss:$16 sps:$4 sm:$0xff]   ;;  %v5670_v16 = vld [vmem:[#allocation2 + $0x264] ss:$16 sps:$4 sm:$0xff]   ;;  %v5673_v17 = vld [vmem:[#allocation2 + $0x26c] ss:$16 sps:$4 sm:$0xff]  }
  0x41   :  { %v5674_v18 = vld [vmem:[%s6890_s0 + $0x74] ss:$28 sps:$4 sm:$0xff]   ;;  %v5671_v20 = vld [vmem:[#allocation2 + $0x268] ss:$16 sps:$4 sm:$0xff]   ;;  %v5682_v22 = vld [vmem:[#allocation2 + $0x28c] ss:$16 sps:$4 sm:$0xff]  }
  0x42   :  { %v5679_v21 = vld [vmem:[#allocation2 + $0x284] ss:$16 sps:$4 sm:$0xff]   ;;  %v5676_v23 = vld [vmem:[%s6890_s0 + $0x70] ss:$28 sps:$4 sm:$0xff]   ;;  %v5680_v25 = vld [vmem:[#allocation2 + $0x288] ss:$16 sps:$4 sm:$0xff]  }
  0x43   :  { %1788 = vmatpush1.bf16.msra.mxu0 %v5594_v30  ;;  %2240 = vmatpush1.bf16.msra.mxu1 %v5595_v31  ;;  %v5677_v24 = vld [vmem:[#allocation2 + $0x280] ss:$16 sps:$4 sm:$0xff]   ;;  %v5685_v26 = vld [vmem:[#allocation2 + $0x2a4] ss:$16 sps:$4 sm:$0xff]   ;;  %v5688_v27 = vld [vmem:[#allocation2 + $0x2ac] ss:$16 sps:$4 sm:$0xff]  }
  0x44   :  { %1789 = vmatprep.subr.bf16.mxu0 %v5596_v32  ;;  %2241 = vmatprep.subr.bf16.mxu1 %v5598_v33  ;;  %v5689_v28 = vld [vmem:[%s6890_s0 + $0xac] ss:$28 sps:$4 sm:$0xff]   ;;  %v5683_v29 = vld [vmem:[#allocation2 + $0x2a0] ss:$16 sps:$4 sm:$0xff]   ;;  %v5694_v31 = vld [vmem:[#allocation2 + $0x2c4] ss:$16 sps:$4 sm:$0xff]  }
  0x45   :  { %v5686_v30 = vld [vmem:[#allocation2 + $0x2a8] ss:$16 sps:$4 sm:$0xff]   ;;  %v5697_v32 = vld [vmem:[#allocation2 + $0x2cc] ss:$16 sps:$4 sm:$0xff]  }
  0x46   :  { %v5691_v33 = vld [vmem:[%s6890_s0 + $0xa8] ss:$28 sps:$4 sm:$0xff]   ;;  %v5719_v48 = vld [vmem:[%s6890_s0 + $0x11c] ss:$28 sps:$4 sm:$0xff]  }
  0x47   :  { %1790 = vmatpush1.bf16.msra.mxu0 %v5600_v34  ;;  %2242 = vmatpush1.bf16.msra.mxu1 %v5601_v35  ;;  %v5692_v34 = vld [vmem:[#allocation2 + $0x2c0] ss:$16 sps:$4 sm:$0xff]   ;;  %v5695_v35 = vld [vmem:[#allocation2 + $0x2c8] ss:$16 sps:$4 sm:$0xff]  }
  0x48   :  { %1791 = vmatprep.subr.bf16.mxu0 %v5602_v36  ;;  %2243 = vmatprep.subr.bf16.mxu1 %v5604_v37  ;;  %v5700_v36 = vld [vmem:[#allocation2 + $0x2e4] ss:$16 sps:$4 sm:$0xff]   ;;  %v5703_v37 = vld [vmem:[#allocation2 + $0x2ec] ss:$16 sps:$4 sm:$0xff]  }
  0x4b   :  { %1792 = vmatpush1.bf16.msra.mxu0 %v5606_v38  ;;  %2244 = vmatpush1.bf16.msra.mxu1 %v5607_v39  ;;  %v5704_v38 = vld [vmem:[%s6890_s0 + $0xe4] ss:$28 sps:$4 sm:$0xff]  }
  0x4c   :  { %1793 = vmatprep.subr.bf16.mxu0 %v5608_v40  ;;  %2245 = vmatprep.subr.bf16.mxu1 %v5610_v41  ;;  %v5698_v39 = vld [vmem:[#allocation2 + $0x2e0] ss:$16 sps:$4 sm:$0xff]   ;;  %v5701_v40 = vld [vmem:[#allocation2 + $0x2e8] ss:$16 sps:$4 sm:$0xff]   ;;  %v5709_v41 = vld [vmem:[#allocation2 + $0x304] ss:$16 sps:$4 sm:$0xff]  }
  0x4f   :  { %1794 = vmatpush1.bf16.msra.mxu0 %v5612_v42  ;;  %2246 = vmatpush1.bf16.msra.mxu1 %v5613_v43  ;;  %v5712_v42 = vld [vmem:[#allocation2 + $0x30c] ss:$16 sps:$4 sm:$0xff]  }
  0x50   :  { %1795 = vmatprep.subr.bf16.mxu0 %v5614_v44  ;;  %2247 = vmatprep.subr.bf16.mxu1 %v5616_v45  ;;  %v5706_v43 = vld [vmem:[%s6890_s0 + $0xe0] ss:$28 sps:$4 sm:$0xff]   ;;  %v5710_v45 = vld [vmem:[#allocation2 + $0x308] ss:$16 sps:$4 sm:$0xff]  }
  0x51   :  { %v5707_v44 = vld [vmem:[#allocation2 + $0x300] ss:$16 sps:$4 sm:$0xff]  }
  0x53   :  { %1796 = vmatpush1.bf16.msra.mxu0 %v5618_v46  ;;  %2248 = vmatpush1.bf16.msra.mxu1 %v5619_v47  ;;  %v5715_v46 = vld [vmem:[#allocation2 + $0x324] ss:$16 sps:$4 sm:$0xff]   ;;  %v5718_v47 = vld [vmem:[#allocation2 + $0x32c] ss:$16 sps:$4 sm:$0xff]  }
  0x54   :  { %1797 = vmatprep.subr.bf16.mxu0 %v5620_v49  ;;  %2249 = vmatprep.subr.bf16.mxu1 %v5622_v50  ;;  %v5713_v49 = vld [vmem:[#allocation2 + $0x320] ss:$16 sps:$4 sm:$0xff]   ;;  %v5716_v50 = vld [vmem:[#allocation2 + $0x328] ss:$16 sps:$4 sm:$0xff]  }
  0x57   :  { %1798 = vmatpush1.bf16.msra.mxu0 %v5624_v51  ;;  %2250 = vmatpush1.bf16.msra.mxu1 %v5625_v52  ;;  %v5724_v51 = vld [vmem:[#allocation2 + $0x344] ss:$16 sps:$4 sm:$0xff]   ;;  %v5727_v52 = vld [vmem:[#allocation2 + $0x34c] ss:$16 sps:$4 sm:$0xff]  }
  0x58   :  { %1799 = vmatprep.subr.bf16.mxu0 %v5626_v53  ;;  %2251 = vmatprep.subr.bf16.mxu1 %v5628_v54  ;;  %v5721_v53 = vld [vmem:[%s6890_s0 + $0x118] ss:$28 sps:$4 sm:$0xff]   ;;  %v5722_v54 = vld [vmem:[#allocation2 + $0x340] ss:$16 sps:$4 sm:$0xff]  }
  0x5b   :  { %1800 = vmatpush1.bf16.msra.mxu0 %v5630_v55  ;;  %2252 = vmatpush1.bf16.msra.mxu1 %v5631_v56  ;;  %v5725_v55 = vld [vmem:[#allocation2 + $0x348] ss:$16 sps:$4 sm:$0xff]   ;;  %v5730_v56 = vld [vmem:[#allocation2 + $0x364] ss:$16 sps:$4 sm:$0xff]  }
  0x5c   :  { %1801 = vmatprep.subr.bf16.mxu0 %v5632_v57  ;;  %2253 = vmatprep.subr.bf16.mxu1 %v5634_v58  ;;  %v5733_v57 = vld [vmem:[#allocation2 + $0x36c] ss:$16 sps:$4 sm:$0xff]   ;;  %v5734_v58 = vld [vmem:[%s6890_s0 + $0x154] ss:$28 sps:$4 sm:$0xff]  }
  0x5f   :  { %1802 = vmatpush1.bf16.msra.mxu0 %v5636_v59  ;;  %2254 = vmatpush1.bf16.msra.mxu1 %v5637_v60  ;;  %v5728_v59 = vld [vmem:[#allocation2 + $0x360] ss:$16 sps:$4 sm:$0xff]   ;;  %v5731_v60 = vld [vmem:[#allocation2 + $0x368] ss:$16 sps:$4 sm:$0xff]  }
  0x60   :  { %1803 = vmatprep.subr.bf16.mxu0 %v5638_v61  ;;  %2255 = vmatprep.subr.bf16.mxu1 %v5640_v62  ;;  %v5739_v61 = vld [vmem:[#allocation2 + $0x384] ss:$16 sps:$4 sm:$0xff]   ;;  %v5742_v62 = vld [vmem:[#allocation2 + $0x38c] ss:$16 sps:$4 sm:$0xff]  }
  0x63   :  { %1804 = vmatpush1.bf16.msra.mxu0 %v5642_v63  ;;  %2256 = vmatpush1.bf16.msra.mxu1 %v5643_v0  ;;  %v5736_v63 = vld [vmem:[%s6890_s0 + $0x150] ss:$28 sps:$4 sm:$0xff]  }
  0x64   :  { %1886 = vmatprep.subr.bf16.mxu0 %v5649_v1  ;;  %2338 = vmatprep.subr.bf16.mxu1 %v5652_v2  ;;  %v5737_v0 = vld [vmem:[#allocation2 + $0x380] ss:$16 sps:$4 sm:$0xff]   ;;  %v5740_v1 = vld [vmem:[#allocation2 + $0x388] ss:$16 sps:$4 sm:$0xff]   ;;  %v5745_v2 = vld [vmem:[#allocation2 + $0x3a4] ss:$16 sps:$4 sm:$0xff]  }
  0x66   :  { %1806 = vmatmul.mubr.bf16.vlgmr.msra.gmra.mrb[0].mxu0 %v5644_v3  ;;  %2258 = vmatmul.mubr.bf16.vlgmr.msra.gmra.mrb[0].mxu1 %v5644_v3  ;;  %v5748_v3 = vld [vmem:[#allocation2 + $0x3ac] ss:$16 sps:$4 sm:$0xff]  }
  0x67   :  { %1887 = vmatpush1.bf16.msra.mxu0 %v5647_v4  ;;  %2339 = vmatpush1.bf16.msra.mxu1 %v5650_v5  ;;  %v5749_v4 = vld [vmem:[%s6890_s0 + $0x18c] ss:$28 sps:$4 sm:$0xff]   ;;  %v5743_v5 = vld [vmem:[#allocation2 + $0x3a0] ss:$16 sps:$4 sm:$0xff]  }
  0x68   :  { %1888 = vmatprep.subr.bf16.mxu0 %v5655_v6  ;;  %2340 = vmatprep.subr.bf16.mxu1 %v5658_v7  ;;  %v5746_v6 = vld [vmem:[#allocation2 + $0x3a8] ss:$16 sps:$4 sm:$0xff]   ;;  %v5754_v7 = vld [vmem:[#allocation2 + $0x3c4] ss:$16 sps:$4 sm:$0xff]  }
  0x69   :  { %1815 = vmatprep.mubr.bf16.mxu0 %v5659_v8  ;;  %2267 = vmatprep.mubr.bf16.mxu1 %v5659_v8  ;;  %v5757_v8 = vld [vmem:[#allocation2 + $0x3cc] ss:$16 sps:$4 sm:$0xff]  }
  0x6b   :  { %1889 = vmatpush1.bf16.msra.mxu0 %v5653_v9  ;;  %2341 = vmatpush1.bf16.msra.mxu1 %v5656_v10  ;;  %v5751_v9 = vld [vmem:[%s6890_s0 + $0x188] ss:$28 sps:$4 sm:$0xff]   ;;  %v5752_v10 = vld [vmem:[#allocation2 + $0x3c0] ss:$16 sps:$4 sm:$0xff]  }
  0x6c   :  { %1890 = vmatprep.subr.bf16.mxu0 %v5664_v11  ;;  %2342 = vmatprep.subr.bf16.mxu1 %v5667_v12  ;;  %v5755_v11 = vld [vmem:[#allocation2 + $0x3c8] ss:$16 sps:$4 sm:$0xff]   ;;  %v5760_v12 = vld [vmem:[#allocation2 + $0x3e4] ss:$16 sps:$4 sm:$0xff]  }
  0x6e   :  { %1816 = vmatmul.mubr.bf16.gmra.mrb[4].mxu0 %v5661_v13  ;;  %2268 = vmatmul.mubr.bf16.gmra.mrb[4].mxu1 %v5661_v13  ;;  %v5763_v13 = vld [vmem:[#allocation2 + $0x3ec] ss:$16 sps:$4 sm:$0xff]  }
  0x6f   :  { %1891 = vmatpush1.bf16.msra.mxu0 %v5662_v14  ;;  %2343 = vmatpush1.bf16.msra.mxu1 %v5665_v15  ;;  %v5766_v14 = vld [vmem:[%s6890_s0 + $0xc] ss:$28 sps:$4 sm:$0xff]   ;;  %v5758_v15 = vld [vmem:[#allocation2 + $0x3e0] ss:$16 sps:$4 sm:$0xff]  }
  0x70   :  { %1892 = vmatprep.subr.bf16.mxu0 %v5670_v16  ;;  %2344 = vmatprep.subr.bf16.mxu1 %v5673_v17  ;;  %v5761_v16 = vld [vmem:[#allocation2 + $0x3e8] ss:$16 sps:$4 sm:$0xff]   ;;  %v5769_v17 = vld [vmem:[#allocation2 + $0x404] ss:$16 sps:$4 sm:$0xff]  }
  0x71   :  { %1825 = vmatprep.mubr.bf16.mxu0 %v5674_v18  ;;  %2277 = vmatprep.mubr.bf16.mxu1 %v5674_v18  ;;  %v5772_v18 = vld [vmem:[#allocation2 + $0x40c] ss:$16 sps:$4 sm:$0xff]  }
  0x73   :  { %1893 = vmatpush1.bf16.msra.mxu0 %v5668_v19  ;;  %2345 = vmatpush1.bf16.msra.mxu1 %v5671_v20  ;;  %v5764_v19 = vld [vmem:[%s6890_s0 + $0x8] ss:$28 sps:$4 sm:$0xff]   ;;  %v5767_v20 = vld [vmem:[#allocation2 + $0x400] ss:$16 sps:$4 sm:$0xff]  }
  0x74   :  { %1894 = vmatprep.subr.bf16.mxu0 %v5679_v21  ;;  %2346 = vmatprep.subr.bf16.mxu1 %v5682_v22  ;;  %v5770_v21 = vld [vmem:[#allocation2 + $0x408] ss:$16 sps:$4 sm:$0xff]   ;;  %v5775_v22 = vld [vmem:[#allocation2 + $0x424] ss:$16 sps:$4 sm:$0xff]  }
  0x76   :  { %1826 = vmatmul.mubr.bf16.gmra.mrb[8].mxu0 %v5676_v23  ;;  %2278 = vmatmul.mubr.bf16.gmra.mrb[8].mxu1 %v5676_v23  ;;  %v5778_v23 = vld [vmem:[#allocation2 + $0x42c] ss:$16 sps:$4 sm:$0xff]  }
  0x77   :  { %1895 = vmatpush1.bf16.msra.mxu0 %v5677_v24  ;;  %2347 = vmatpush1.bf16.msra.mxu1 %v5680_v25  ;;  %v5779_v24 = vld [vmem:[%s6890_s0 + $0x44] ss:$28 sps:$4 sm:$0xff]  }
  0x78   :  { %1896 = vmatprep.subr.bf16.mxu0 %v5685_v26  ;;  %2348 = vmatprep.subr.bf16.mxu1 %v5688_v27  ;;  %v5773_v25 = vld [vmem:[#allocation2 + $0x420] ss:$16 sps:$4 sm:$0xff]   ;;  %v5776_v26 = vld [vmem:[#allocation2 + $0x428] ss:$16 sps:$4 sm:$0xff]   ;;  %v5784_v27 = vld [vmem:[#allocation2 + $0x444] ss:$16 sps:$4 sm:$0xff]  }
  0x79   :  { %1835 = vmatprep.mubr.bf16.mxu0 %v5689_v28  ;;  %2287 = vmatprep.mubr.bf16.mxu1 %v5689_v28  ;;  %v5787_v28 = vld [vmem:[#allocation2 + $0x44c] ss:$16 sps:$4 sm:$0xff]  }
  0x7b   :  { %1897 = vmatpush1.bf16.msra.mxu0 %v5683_v29  ;;  %2349 = vmatpush1.bf16.msra.mxu1 %v5686_v30  ;;  %v5781_v29 = vld [vmem:[%s6890_s0 + $0x40] ss:$28 sps:$4 sm:$0xff]  }
  0x7c   :  { %1898 = vmatprep.subr.bf16.mxu0 %v5694_v31  ;;  %2350 = vmatprep.subr.bf16.mxu1 %v5697_v32  ;;  %v5782_v30 = vld [vmem:[#allocation2 + $0x440] ss:$16 sps:$4 sm:$0xff]   ;;  %v5785_v31 = vld [vmem:[#allocation2 + $0x448] ss:$16 sps:$4 sm:$0xff]   ;;  %v5790_v32 = vld [vmem:[#allocation2 + $0x464] ss:$16 sps:$4 sm:$0xff]  }
  0x7e   :  { %1836 = vmatmul.mubr.bf16.gmra.mrb[12].mxu0 %v5691_v33  ;;  %2288 = vmatmul.mubr.bf16.gmra.mrb[12].mxu1 %v5691_v33  ;;  %v5793_v33 = vld [vmem:[#allocation2 + $0x46c] ss:$16 sps:$4 sm:$0xff]  }
  0x7f   :  { %1899 = vmatpush1.bf16.msra.mxu0 %v5692_v34  ;;  %2351 = vmatpush1.bf16.msra.mxu1 %v5695_v35  ;;  %v5794_v34 = vld [vmem:[%s6890_s0 + $0x7c] ss:$28 sps:$4 sm:$0xff]   ;;  %v5788_v35 = vld [vmem:[#allocation2 + $0x460] ss:$16 sps:$4 sm:$0xff]  }
  0x80   :  { %1900 = vmatprep.subr.bf16.mxu0 %v5700_v36  ;;  %2352 = vmatprep.subr.bf16.mxu1 %v5703_v37  ;;  %v5791_v36 = vld [vmem:[#allocation2 + $0x468] ss:$16 sps:$4 sm:$0xff]   ;;  %v5799_v37 = vld [vmem:[#allocation2 + $0x484] ss:$16 sps:$4 sm:$0xff]  }
  0x81   :  { %1845 = vmatprep.mubr.bf16.mxu0 %v5704_v38  ;;  %2297 = vmatprep.mubr.bf16.mxu1 %v5704_v38  ;;  %v5802_v38 = vld [vmem:[#allocation2 + $0x48c] ss:$16 sps:$4 sm:$0xff]  }
  0x83   :  { %1901 = vmatpush1.bf16.msra.mxu0 %v5698_v39  ;;  %2353 = vmatpush1.bf16.msra.mxu1 %v5701_v40  ;;  %v5796_v39 = vld [vmem:[%s6890_s0 + $0x78] ss:$28 sps:$4 sm:$0xff]   ;;  %v5797_v40 = vld [vmem:[#allocation2 + $0x480] ss:$16 sps:$4 sm:$0xff]  }
  0x84   :  { %1902 = vmatprep.subr.bf16.mxu0 %v5709_v41  ;;  %2354 = vmatprep.subr.bf16.mxu1 %v5712_v42  ;;  %v5800_v41 = vld [vmem:[#allocation2 + $0x488] ss:$16 sps:$4 sm:$0xff]   ;;  %v5805_v42 = vld [vmem:[#allocation2 + $0x4a4] ss:$16 sps:$4 sm:$0xff]  }
  0x86   :  { %1846 = vmatmul.mubr.bf16.gmra.mrb[16].mxu0 %v5706_v43  ;;  %2298 = vmatmul.mubr.bf16.gmra.mrb[16].mxu1 %v5706_v43  ;;  %v5808_v43 = vld [vmem:[#allocation2 + $0x4ac] ss:$16 sps:$4 sm:$0xff]  }
  0x87   :  { %1903 = vmatpush1.bf16.msra.mxu0 %v5707_v44  ;;  %2355 = vmatpush1.bf16.msra.mxu1 %v5710_v45  ;;  %v5809_v44 = vld [vmem:[%s6890_s0 + $0xb4] ss:$28 sps:$4 sm:$0xff]  }
  0x88   :  { %1904 = vmatprep.subr.bf16.mxu0 %v5715_v46  ;;  %2356 = vmatprep.subr.bf16.mxu1 %v5718_v47  ;;  %v5803_v45 = vld [vmem:[#allocation2 + $0x4a0] ss:$16 sps:$4 sm:$0xff]   ;;  %v5806_v46 = vld [vmem:[#allocation2 + $0x4a8] ss:$16 sps:$4 sm:$0xff]   ;;  %v5814_v47 = vld [vmem:[#allocation2 + $0x4c4] ss:$16 sps:$4 sm:$0xff]  }
  0x89   :  { %1855 = vmatprep.mubr.bf16.mxu0 %v5719_v48  ;;  %2307 = vmatprep.mubr.bf16.mxu1 %v5719_v48  ;;  %v5817_v48 = vld [vmem:[#allocation2 + $0x4cc] ss:$16 sps:$4 sm:$0xff]  }
  0x8b   :  { %1905 = vmatpush1.bf16.msra.mxu0 %v5713_v49  ;;  %2357 = vmatpush1.bf16.msra.mxu1 %v5716_v50  ;;  %v5811_v49 = vld [vmem:[%s6890_s0 + $0xb0] ss:$28 sps:$4 sm:$0xff]  }
  0x8c   :  { %1906 = vmatprep.subr.bf16.mxu0 %v5724_v51  ;;  %2358 = vmatprep.subr.bf16.mxu1 %v5727_v52  ;;  %v5812_v50 = vld [vmem:[#allocation2 + $0x4c0] ss:$16 sps:$4 sm:$0xff]   ;;  %v5815_v51 = vld [vmem:[#allocation2 + $0x4c8] ss:$16 sps:$4 sm:$0xff]   ;;  %v5820_v52 = vld [vmem:[#allocation2 + $0x4e4] ss:$16 sps:$4 sm:$0xff]  }
  0x8e   :  { %1856 = vmatmul.mubr.bf16.gmra.mrb[20].mxu0 %v5721_v53  ;;  %2308 = vmatmul.mubr.bf16.gmra.mrb[20].mxu1 %v5721_v53  ;;  %v5823_v53 = vld [vmem:[#allocation2 + $0x4ec] ss:$16 sps:$4 sm:$0xff]  }
  0x8f   :  { %1907 = vmatpush1.bf16.msra.mxu0 %v5722_v54  ;;  %2359 = vmatpush1.bf16.msra.mxu1 %v5725_v55  ;;  %v5824_v54 = vld [vmem:[%s6890_s0 + $0xec] ss:$28 sps:$4 sm:$0xff]   ;;  %v5818_v55 = vld [vmem:[#allocation2 + $0x4e0] ss:$16 sps:$4 sm:$0xff]  }
  0x90   :  { %1908 = vmatprep.subr.bf16.mxu0 %v5730_v56  ;;  %2360 = vmatprep.subr.bf16.mxu1 %v5733_v57  ;;  %v5821_v56 = vld [vmem:[#allocation2 + $0x4e8] ss:$16 sps:$4 sm:$0xff]   ;;  %v5829_v57 = vld [vmem:[#allocation2 + $0x504] ss:$16 sps:$4 sm:$0xff]  }
  0x91   :  { %1865 = vmatprep.mubr.bf16.mxu0 %v5734_v58  ;;  %2317 = vmatprep.mubr.bf16.mxu1 %v5734_v58  ;;  %v5832_v58 = vld [vmem:[#allocation2 + $0x50c] ss:$16 sps:$4 sm:$0xff]  }
  0x93   :  { %1909 = vmatpush1.bf16.msra.mxu0 %v5728_v59  ;;  %2361 = vmatpush1.bf16.msra.mxu1 %v5731_v60  ;;  %v5826_v59 = vld [vmem:[%s6890_s0 + $0xe8] ss:$28 sps:$4 sm:$0xff]   ;;  %v5827_v60 = vld [vmem:[#allocation2 + $0x500] ss:$16 sps:$4 sm:$0xff]  }
  0x94   :  { %1910 = vmatprep.subr.bf16.mxu0 %v5739_v61  ;;  %2362 = vmatprep.subr.bf16.mxu1 %v5742_v62  ;;  %v5830_v61 = vld [vmem:[#allocation2 + $0x508] ss:$16 sps:$4 sm:$0xff]   ;;  %v5835_v62 = vld [vmem:[#allocation2 + $0x524] ss:$16 sps:$4 sm:$0xff]  }
  0x96   :  { %1866 = vmatmul.mubr.bf16.gmra.mrb[24].mxu0 %v5736_v63  ;;  %2318 = vmatmul.mubr.bf16.gmra.mrb[24].mxu1 %v5736_v63  ;;  %v5838_v63 = vld [vmem:[#allocation2 + $0x52c] ss:$16 sps:$4 sm:$0xff]  }
  0x97   :  { %1911 = vmatpush1.bf16.msra.mxu0 %v5737_v0  ;;  %2363 = vmatpush1.bf16.msra.mxu1 %v5740_v1  ;;  %v5839_v0 = vld [vmem:[%s6890_s0 + $0x124] ss:$28 sps:$4 sm:$0xff]  }
  0x98   :  { %1912 = vmatprep.subr.bf16.mxu0 %v5745_v2  ;;  %2364 = vmatprep.subr.bf16.mxu1 %v5748_v3  ;;  %v5833_v1 = vld [vmem:[#allocation2 + $0x520] ss:$16 sps:$4 sm:$0xff]   ;;  %v5836_v2 = vld [vmem:[#allocation2 + $0x528] ss:$16 sps:$4 sm:$0xff]   ;;  %v5844_v3 = vld [vmem:[#allocation2 + $0x544] ss:$16 sps:$4 sm:$0xff]  }
  0x99   :  { %1875 = vmatprep.mubr.bf16.mxu0 %v5749_v4  ;;  %2327 = vmatprep.mubr.bf16.mxu1 %v5749_v4  ;;  %v5847_v4 = vld [vmem:[#allocation2 + $0x54c] ss:$16 sps:$4 sm:$0xff]  }
  0x9b   :  { %1913 = vmatpush1.bf16.msra.mxu0 %v5743_v5  ;;  %2365 = vmatpush1.bf16.msra.mxu1 %v5746_v6  ;;  %v5841_v5 = vld [vmem:[%s6890_s0 + $0x120] ss:$28 sps:$4 sm:$0xff]  }
  0x9c   :  { %1914 = vmatprep.subr.bf16.mxu0 %v5754_v7  ;;  %2366 = vmatprep.subr.bf16.mxu1 %v5757_v8  ;;  %v5842_v6 = vld [vmem:[#allocation2 + $0x540] ss:$16 sps:$4 sm:$0xff]   ;;  %v5845_v7 = vld [vmem:[#allocation2 + $0x548] ss:$16 sps:$4 sm:$0xff]   ;;  %v5850_v8 = vld [vmem:[#allocation2 + $0x564] ss:$16 sps:$4 sm:$0xff]  }
  0x9e   :  { %1876 = vmatmul.mubr.bf16.gmra.mrb[28].mxu0 %v5751_v9  ;;  %2328 = vmatmul.mubr.bf16.gmra.mrb[28].mxu1 %v5751_v9  ;;  %v5853_v9 = vld [vmem:[#allocation2 + $0x56c] ss:$16 sps:$4 sm:$0xff]  }
  0x9f   :  { %1915 = vmatpush1.bf16.msra.mxu0 %v5752_v10  ;;  %2367 = vmatpush1.bf16.msra.mxu1 %v5755_v11  ;;  %v5854_v10 = vld [vmem:[%s6890_s0 + $0x15c] ss:$28 sps:$4 sm:$0xff]   ;;  %v5848_v11 = vld [vmem:[#allocation2 + $0x560] ss:$16 sps:$4 sm:$0xff]  }
  0xa0   :  { %1916 = vmatprep.subr.bf16.mxu0 %v5760_v12  ;;  %2368 = vmatprep.subr.bf16.mxu1 %v5763_v13  ;;  %v5851_v12 = vld [vmem:[#allocation2 + $0x568] ss:$16 sps:$4 sm:$0xff]   ;;  %v5859_v13 = vld [vmem:[#allocation2 + $0x584] ss:$16 sps:$4 sm:$0xff]  }
  0xa1   :  { %1918 = vmatprep.mubr.bf16.mxu0 %v5766_v14  ;;  %2370 = vmatprep.mubr.bf16.mxu1 %v5766_v14  ;;  %v5862_v14 = vld [vmem:[#allocation2 + $0x58c] ss:$16 sps:$4 sm:$0xff]  }
  0xa3   :  { %1917 = vmatpush1.bf16.msra.mxu0 %v5758_v15  ;;  %2369 = vmatpush1.bf16.msra.mxu1 %v5761_v16  ;;  %v5856_v15 = vld [vmem:[%s6890_s0 + $0x158] ss:$28 sps:$4 sm:$0xff]   ;;  %v5857_v16 = vld [vmem:[#allocation2 + $0x580] ss:$16 sps:$4 sm:$0xff]  }
  0xa4   :  { %1999 = vmatprep.subr.bf16.mxu0 %v5769_v17  ;;  %2451 = vmatprep.subr.bf16.mxu1 %v5772_v18  ;;  %v5860_v17 = vld [vmem:[#allocation2 + $0x588] ss:$16 sps:$4 sm:$0xff]   ;;  %v5865_v18 = vld [vmem:[#allocation2 + $0x5a4] ss:$16 sps:$4 sm:$0xff]  }
  0xa6   :  { %1919 = vmatmul.mubr.bf16.vlgmr.msra.gmra.mrb[0].mxu0 %v5764_v19  ;;  %2371 = vmatmul.mubr.bf16.vlgmr.msra.gmra.mrb[0].mxu1 %v5764_v19  ;;  %v5868_v19 = vld [vmem:[#allocation2 + $0x5ac] ss:$16 sps:$4 sm:$0xff]  }
  0xa7   :  { %2000 = vmatpush1.bf16.msra.mxu0 %v5767_v20  ;;  %2452 = vmatpush1.bf16.msra.mxu1 %v5770_v21  ;;  %v5869_v20 = vld [vmem:[%s6890_s0 + $0x194] ss:$28 sps:$4 sm:$0xff]  }
  0xa8   :  { %2001 = vmatprep.subr.bf16.mxu0 %v5775_v22  ;;  %2453 = vmatprep.subr.bf16.mxu1 %v5778_v23  ;;  %v5863_v21 = vld [vmem:[#allocation2 + $0x5a0] ss:$16 sps:$4 sm:$0xff]   ;;  %v5866_v22 = vld [vmem:[#allocation2 + $0x5a8] ss:$16 sps:$4 sm:$0xff]   ;;  %v5874_v23 = vld [vmem:[#allocation2 + $0x5c4] ss:$16 sps:$4 sm:$0xff]  }
  0xa9   :  { %1928 = vmatprep.mubr.bf16.mxu0 %v5779_v24  ;;  %2380 = vmatprep.mubr.bf16.mxu1 %v5779_v24  ;;  %v5871_v24 = vld [vmem:[%s6890_s0 + $0x190] ss:$28 sps:$4 sm:$0xff]  }
  0xab   :  { %2002 = vmatpush1.bf16.msra.mxu0 %v5773_v25  ;;  %2454 = vmatpush1.bf16.msra.mxu1 %v5776_v26  ;;  %v5877_v25 = vld [vmem:[#allocation2 + $0x5cc] ss:$16 sps:$4 sm:$0xff]   ;;  %v5872_v26 = vld [vmem:[#allocation2 + $0x5c0] ss:$16 sps:$4 sm:$0xff]  }
  0xac   :  { %2003 = vmatprep.subr.bf16.mxu0 %v5784_v27  ;;  %2455 = vmatprep.subr.bf16.mxu1 %v5787_v28  ;;  %v5875_v27 = vld [vmem:[#allocation2 + $0x5c8] ss:$16 sps:$4 sm:$0xff]   ;;  %v5880_v28 = vld [vmem:[#allocation2 + $0x5e4] ss:$16 sps:$4 sm:$0xff]  }
  0xae   :  { %1929 = vmatmul.mubr.bf16.gmra.mrb[4].mxu0 %v5781_v29  ;;  %2381 = vmatmul.mubr.bf16.gmra.mrb[4].mxu1 %v5781_v29  ;;  %v5883_v29 = vld [vmem:[#allocation2 + $0x5ec] ss:$16 sps:$4 sm:$0xff]  }
  0xaf   :  { %2004 = vmatpush1.bf16.msra.mxu0 %v5782_v30  ;;  %2456 = vmatpush1.bf16.msra.mxu1 %v5785_v31  ;;  %v5878_v30 = vld [vmem:[#allocation2 + $0x5e0] ss:$16 sps:$4 sm:$0xff]  }
  0xb0   :  { %2005 = vmatprep.subr.bf16.mxu0 %v5790_v32  ;;  %2457 = vmatprep.subr.bf16.mxu1 %v5793_v33  ;;  %v5886_v31 = vld [vmem:[%s6890_s0 + $0x14] ss:$28 sps:$4 sm:$0xff]   ;;  %v5881_v32 = vld [vmem:[#allocation2 + $0x5e8] ss:$16 sps:$4 sm:$0xff]  }
  0xb1   :  { %1938 = vmatprep.mubr.bf16.mxu0 %v5794_v34  ;;  %2390 = vmatprep.mubr.bf16.mxu1 %v5794_v34  ;;  %v5889_v33 = vld [vmem:[#allocation2 + $0x604] ss:$16 sps:$4 sm:$0xff]   ;;  %v5916_v34 = vld [vmem:[#allocation2 + $0x60c] ss:$16 sps:$4 sm:$0xff]  }
  0xb3   :  { %2006 = vmatpush1.bf16.msra.mxu0 %v5788_v35  ;;  %2458 = vmatpush1.bf16.msra.mxu1 %v5791_v36  ;;  %v5884_v35 = vld [vmem:[%s6890_s0 + $0x10] ss:$28 sps:$4 sm:$0xff]  }
  0xb4   :  { %2007 = vmatprep.subr.bf16.mxu0 %v5799_v37  ;;  %2459 = vmatprep.subr.bf16.mxu1 %v5802_v38  ;;  %v5887_v36 = vld [vmem:[#allocation2 + $0x600] ss:$16 sps:$4 sm:$0xff]   ;;  %v5890_v37 = vld [vmem:[%s6890_s0 + $0x4c] ss:$28 sps:$4 sm:$0xff]   ;;  %v5895_v38 = vld [vmem:[#allocation2 + $0x624] ss:$16 sps:$4 sm:$0xff]  }
  0xb6   :  { %1939 = vmatmul.mubr.bf16.gmra.mrb[8].mxu0 %v5796_v39  ;;  %2391 = vmatmul.mubr.bf16.gmra.mrb[8].mxu1 %v5796_v39  ;;  %v5914_v39 = vld [vmem:[#allocation2 + $0x608] ss:$16 sps:$4 sm:$0xff]  }
  0xb7   :  { %2008 = vmatpush1.bf16.msra.mxu0 %v5797_v40  ;;  %2460 = vmatpush1.bf16.msra.mxu1 %v5800_v41  ;;  %v5919_v40 = vld [vmem:[#allocation2 + $0x62c] ss:$16 sps:$4 sm:$0xff]   ;;  %v5893_v41 = vld [vmem:[#allocation2 + $0x620] ss:$16 sps:$4 sm:$0xff]  }
  0xb8   :  { %2009 = vmatprep.subr.bf16.mxu0 %v5805_v42  ;;  %2461 = vmatprep.subr.bf16.mxu1 %v5808_v43  ;;  %v5901_v42 = vld [vmem:[#allocation2 + $0x644] ss:$16 sps:$4 sm:$0xff]   ;;  %v5917_v43 = vld [vmem:[#allocation2 + $0x628] ss:$16 sps:$4 sm:$0xff]  }
  0xb9   :  { %1948 = vmatprep.mubr.bf16.mxu0 %v5809_v44  ;;  %2400 = vmatprep.mubr.bf16.mxu1 %v5809_v44  ;;  %v5892_v44 = vld [vmem:[%s6890_s0 + $0x48] ss:$28 sps:$4 sm:$0xff]  }
  0xbb   :  { %2010 = vmatpush1.bf16.msra.mxu0 %v5803_v45  ;;  %2462 = vmatpush1.bf16.msra.mxu1 %v5806_v46  ;;  %v5896_v45 = vld [vmem:[%s6890_s0 + $0x84] ss:$28 sps:$4 sm:$0xff]  }
  0xbc   :  { %2011 = vmatprep.subr.bf16.mxu0 %v5814_v47  ;;  %2463 = vmatprep.subr.bf16.mxu1 %v5817_v48  ;;  %v5899_v46 = vld [vmem:[#allocation2 + $0x640] ss:$16 sps:$4 sm:$0xff]   ;;  %v5928_v47 = vld [vmem:[#allocation2 + $0x64c] ss:$16 sps:$4 sm:$0xff]   ;;  %v5907_v48 = vld [vmem:[#allocation2 + $0x664] ss:$16 sps:$4 sm:$0xff]  }
  0xbe   :  { %1949 = vmatmul.mubr.bf16.gmra.mrb[12].mxu0 %v5811_v49  ;;  %2401 = vmatmul.mubr.bf16.gmra.mrb[12].mxu1 %v5811_v49  ;;  %v5926_v49 = vld [vmem:[#allocation2 + $0x648] ss:$16 sps:$4 sm:$0xff]  }
  0xbf   :  { %2012 = vmatpush1.bf16.msra.mxu0 %v5812_v50  ;;  %2464 = vmatpush1.bf16.msra.mxu1 %v5815_v51  ;;  %v5931_v50 = vld [vmem:[#allocation2 + $0x66c] ss:$16 sps:$4 sm:$0xff]   ;;  %v5905_v51 = vld [vmem:[#allocation2 + $0x660] ss:$16 sps:$4 sm:$0xff]  }
  0xc0   :  { %2013 = vmatprep.subr.bf16.mxu0 %v5820_v52  ;;  %2465 = vmatprep.subr.bf16.mxu1 %v5823_v53  ;;  %v5913_v52 = vld [vmem:[#allocation2 + $0x684] ss:$16 sps:$4 sm:$0xff]   ;;  %v5929_v53 = vld [vmem:[#allocation2 + $0x668] ss:$16 sps:$4 sm:$0xff]  }
  0xc1   :  { %1958 = vmatprep.mubr.bf16.mxu0 %v5824_v54  ;;  %2410 = vmatprep.mubr.bf16.mxu1 %v5824_v54  ;;  %v5898_v54 = vld [vmem:[%s6890_s0 + $0x80] ss:$28 sps:$4 sm:$0xff]  }
  0xc3   :  { %2014 = vmatpush1.bf16.msra.mxu0 %v5818_v55  ;;  %2466 = vmatpush1.bf16.msra.mxu1 %v5821_v56  ;;  %v5902_v55 = vld [vmem:[%s6890_s0 + $0xbc] ss:$28 sps:$4 sm:$0xff]   ;;  %v5911_v56 = vld [vmem:[#allocation2 + $0x680] ss:$16 sps:$4 sm:$0xff]  }
  0xc4   :  { %2015 = vmatprep.subr.bf16.mxu0 %v5829_v57  ;;  %2467 = vmatprep.subr.bf16.mxu1 %v5832_v58  ;;  %v5940_v57 = vld [vmem:[#allocation2 + $0x68c] ss:$16 sps:$4 sm:$0xff]   ;;  %v5925_v58 = vld [vmem:[#allocation2 + $0x6a4] ss:$16 sps:$4 sm:$0xff]  }
  0xc6   :  { %1959 = vmatmul.mubr.bf16.gmra.mrb[16].mxu0 %v5826_v59  ;;  %2411 = vmatmul.mubr.bf16.gmra.mrb[16].mxu1 %v5826_v59  ;;  %v5938_v59 = vld [vmem:[#allocation2 + $0x688] ss:$16 sps:$4 sm:$0xff]  }
  0xc7   :  { %2016 = vmatpush1.bf16.msra.mxu0 %v5827_v60  ;;  %2468 = vmatpush1.bf16.msra.mxu1 %v5830_v61  ;;  %v5943_v60 = vld [vmem:[#allocation2 + $0x6ac] ss:$16 sps:$4 sm:$0xff]   ;;  %v5923_v61 = vld [vmem:[#allocation2 + $0x6a0] ss:$16 sps:$4 sm:$0xff]  }
  0xc8   :  { %2017 = vmatprep.subr.bf16.mxu0 %v5835_v62  ;;  %2469 = vmatprep.subr.bf16.mxu1 %v5838_v63  ;;  %v5937_v62 = vld [vmem:[#allocation2 + $0x6c4] ss:$16 sps:$4 sm:$0xff]   ;;  %v5941_v63 = vld [vmem:[#allocation2 + $0x6a8] ss:$16 sps:$4 sm:$0xff]  }
  0xc9   :  { %1968 = vmatprep.mubr.bf16.mxu0 %v5839_v0  ;;  %2420 = vmatprep.mubr.bf16.mxu1 %v5839_v0  ;;  %v5904_v0 = vld [vmem:[%s6890_s0 + $0xb8] ss:$28 sps:$4 sm:$0xff]  }
  0xcb   :  { %2018 = vmatpush1.bf16.msra.mxu0 %v5833_v1  ;;  %2470 = vmatpush1.bf16.msra.mxu1 %v5836_v2  ;;  %v5908_v1 = vld [vmem:[%s6890_s0 + $0xf4] ss:$28 sps:$4 sm:$0xff]  }
  0xcc   :  { %2019 = vmatprep.subr.bf16.mxu0 %v5844_v3  ;;  %2471 = vmatprep.subr.bf16.mxu1 %v5847_v4  ;;  %v5935_v2 = vld [vmem:[#allocation2 + $0x6c0] ss:$16 sps:$4 sm:$0xff]   ;;  %v5952_v3 = vld [vmem:[#allocation2 + $0x6cc] ss:$16 sps:$4 sm:$0xff]   ;;  %v5949_v4 = vld [vmem:[#allocation2 + $0x6e4] ss:$16 sps:$4 sm:$0xff]  }
  0xce   :  { %1969 = vmatmul.mubr.bf16.gmra.mrb[20].mxu0 %v5841_v5  ;;  %2421 = vmatmul.mubr.bf16.gmra.mrb[20].mxu1 %v5841_v5  ;;  %v5950_v5 = vld [vmem:[#allocation2 + $0x6c8] ss:$16 sps:$4 sm:$0xff]  }
  0xcf   :  { %2020 = vmatpush1.bf16.msra.mxu0 %v5842_v6  ;;  %2472 = vmatpush1.bf16.msra.mxu1 %v5845_v7  ;;  %v5955_v6 = vld [vmem:[#allocation2 + $0x6ec] ss:$16 sps:$4 sm:$0xff]   ;;  %v5947_v7 = vld [vmem:[#allocation2 + $0x6e0] ss:$16 sps:$4 sm:$0xff]  }
  0xd0   :  { %2021 = vmatprep.subr.bf16.mxu0 %v5850_v8  ;;  %2473 = vmatprep.subr.bf16.mxu1 %v5853_v9  ;;  %v5953_v8 = vld [vmem:[#allocation2 + $0x6e8] ss:$16 sps:$4 sm:$0xff]   ;;  %v5966_v9 = vld [vmem:[#allocation4 + $0x4] ss:$16 sps:$4 sm:$0xff]  }
  0xd1   :  { %1978 = vmatprep.mubr.bf16.mxu0 %v5854_v10  ;;  %2430 = vmatprep.mubr.bf16.mxu1 %v5854_v10  ;;  %v5910_v10 = vld [vmem:[%s6890_s0 + $0xf0] ss:$28 sps:$4 sm:$0xff]  }
  0xd3   :  { %2022 = vmatpush1.bf16.msra.mxu0 %v5848_v11  ;;  %2474 = vmatpush1.bf16.msra.mxu1 %v5851_v12  ;;  %v5920_v11 = vld [vmem:[%s6890_s0 + $0x12c] ss:$28 sps:$4 sm:$0xff]  }
  0xd4   :  { %2023 = vmatprep.subr.bf16.mxu0 %v5859_v13  ;;  %2475 = vmatprep.subr.bf16.mxu1 %v5862_v14  ;;  %v5969_v12 = vld [vmem:[#allocation4 + $0xc] ss:$16 sps:$4 sm:$0xff]   ;;  %v5922_v13 = vld [vmem:[%s6890_s0 + $0x128] ss:$28 sps:$4 sm:$0xff]  }
  0xd5   :  { %v5932_v14 = vld [vmem:[%s6890_s0 + $0x164] ss:$28 sps:$4 sm:$0xff]  }
  0xd6   :  { %1979 = vmatmul.mubr.bf16.gmra.mrb[24].mxu0 %v5856_v15  ;;  %2431 = vmatmul.mubr.bf16.gmra.mrb[24].mxu1 %v5856_v15  ;;  %v5934_v15 = vld [vmem:[%s6890_s0 + $0x160] ss:$28 sps:$4 sm:$0xff]  }
  0xd7   :  { %2024 = vmatpush1.bf16.msra.mxu0 %v5857_v16  ;;  %2476 = vmatpush1.bf16.msra.mxu1 %v5860_v17  ;;  %v5944_v16 = vld [vmem:[%s6890_s0 + $0x19c] ss:$28 sps:$4 sm:$0xff]  }
  0xd8   :  { %2025 = vmatprep.subr.bf16.mxu0 %v5865_v18  ;;  %2477 = vmatprep.subr.bf16.mxu1 %v5868_v19  ;;  %v5946_v17 = vld [vmem:[%s6890_s0 + $0x198] ss:$28 sps:$4 sm:$0xff]   ;;  %v6240_v18 = vmov 0  }
  0xd9   :  { %1988 = vmatprep.mubr.bf16.mxu0 %v5869_v20  ;;  %2440 = vmatprep.mubr.bf16.mxu1 %v5869_v20  ;;  %v5956_v19 = vld [vmem:[%s6890_s0 + $0x18] ss:$28 sps:$4 sm:$0xff]   ;;  %v5964_v20 = vld [vmem:[#allocation4] ss:$16 sps:$4 sm:$0xff]  }
  0xdb   :  { %2026 = vmatpush1.bf16.msra.mxu0 %v5863_v21  ;;  %2478 = vmatpush1.bf16.msra.mxu1 %v5866_v22  ;;  %v5967_v21 = vld [vmem:[#allocation4 + $0x8] ss:$16 sps:$4 sm:$0xff]   ;;  %v5972_v22 = vld [vmem:[#allocation4 + $0x24] ss:$16 sps:$4 sm:$0xff]  }
  0xdc   :  { %2027 = vmatprep.subr.bf16.mxu0 %v5874_v23  ;;  %2479 = vmatprep.subr.bf16.mxu1 %v5877_v25  ;;  %v5975_v23 = vld [vmem:[#allocation4 + $0x2c] ss:$16 sps:$4 sm:$0xff]   ;;  %v5973_v25 = vld [vmem:[#allocation4 + $0x28] ss:$16 sps:$4 sm:$0xff]  }
  0xde   :  { %1989 = vmatmul.mubr.bf16.gmra.mrb[28].mxu0 %v5871_v24  ;;  %2441 = vmatmul.mubr.bf16.gmra.mrb[28].mxu1 %v5871_v24  ;;  %v5970_v24 = vld [vmem:[#allocation4 + $0x20] ss:$16 sps:$4 sm:$0xff]  }
  0xdf   :  { %2028 = vmatpush1.bf16.msra.mxu0 %v5872_v26  ;;  %2480 = vmatpush1.bf16.msra.mxu1 %v5875_v27  ;;  %v5978_v26 = vld [vmem:[#allocation4 + $0x44] ss:$16 sps:$4 sm:$0xff]   ;;  %v5981_v27 = vld [vmem:[#allocation4 + $0x4c] ss:$16 sps:$4 sm:$0xff]  }
  0xe0   :  { %2029 = vmatprep.subr.bf16.mxu0 %v5880_v28  ;;  %2481 = vmatprep.subr.bf16.mxu1 %v5883_v29  ;;  %v5957_v28 = vld [vmem:[%s6890_s0 + $0x50] ss:$28 sps:$4 sm:$0xff]  }
  0xe1   :  { %2031 = vmatprep.mubr.bf16.mxu0 %v5886_v31  ;;  %2483 = vmatprep.mubr.bf16.mxu1 %v5886_v31  ;;  %v5976_v29 = vld [vmem:[#allocation4 + $0x40] ss:$16 sps:$4 sm:$0xff]   ;;  %v5984_v31 = vld [vmem:[#allocation4 + $0x64] ss:$16 sps:$4 sm:$0xff]  }
  0xe3   :  { %2030 = vmatpush1.bf16.msra.mxu0 %v5878_v30  ;;  %2482 = vmatpush1.bf16.msra.mxu1 %v5881_v32  ;;  %v5979_v30 = vld [vmem:[#allocation4 + $0x48] ss:$16 sps:$4 sm:$0xff]   ;;  %v5987_v32 = vld [vmem:[#allocation4 + $0x6c] ss:$16 sps:$4 sm:$0xff]  }
  0xe4   :  { %2112 = vmatprep.subr.bf16.mxu0 %v5889_v33  ;;  %2564 = vmatprep.subr.bf16.mxu1 %v5916_v34  ;;  %v5982_v33 = vld [vmem:[#allocation4 + $0x60] ss:$16 sps:$4 sm:$0xff]   ;;  %v5985_v34 = vld [vmem:[#allocation4 + $0x68] ss:$16 sps:$4 sm:$0xff]  }
  0xe6   :  { %2032 = vmatmul.mubr.bf16.vlgmr.msra.gmra.mrb[0].mxu0 %v5884_v35  ;;  %2484 = vmatmul.mubr.bf16.vlgmr.msra.gmra.mrb[0].mxu1 %v5884_v35  ;;  %v5990_v35 = vld [vmem:[#allocation4 + $0x84] ss:$16 sps:$4 sm:$0xff]  }
  0xe7   :  { %2113 = vmatpush1.bf16.msra.mxu0 %v5887_v36  ;;  %2041 = vmatprep.mubr.bf16.mxu0 %v5890_v37  ;;  %v5993_v36 = vld [vmem:[#allocation4 + $0x8c] ss:$16 sps:$4 sm:$0xff]  }
  0xe8   :  { %2493 = vmatprep.mubr.bf16.mxu1 %v5890_v37  ;;  %2114 = vmatprep.subr.bf16.mxu0 %v5895_v38  ;;  %v5958_v37 = vld [vmem:[%s6890_s0 + $0x88] ss:$28 sps:$4 sm:$0xff]   ;;  %v5988_v38 = vld [vmem:[#allocation4 + $0x80] ss:$16 sps:$4 sm:$0xff]  }
  0xe9   :  { %2565 = vmatpush1.bf16.msra.mxu1 %v5914_v39  ;;  %v5991_v39 = vld [vmem:[#allocation4 + $0x88] ss:$16 sps:$4 sm:$0xff]  }
  0xea   :  { %2566 = vmatprep.subr.bf16.mxu1 %v5919_v40  ;;  %v5996_v40 = vld [vmem:[#allocation4 + $0xa4] ss:$16 sps:$4 sm:$0xff]  }
  0xeb   :  { %2115 = vmatpush1.bf16.msra.mxu0 %v5893_v41  ;;  %v5999_v41 = vld [vmem:[#allocation4 + $0xac] ss:$16 sps:$4 sm:$0xff]  }
  0xec   :  { %2116 = vmatprep.subr.bf16.mxu0 %v5901_v42  ;;  %v5994_v42 = vld [vmem:[#allocation4 + $0xa0] ss:$16 sps:$4 sm:$0xff]  }
  0xed   :  { %2567 = vmatpush1.bf16.msra.mxu1 %v5917_v43  ;;  %v5997_v43 = vld [vmem:[#allocation4 + $0xa8] ss:$16 sps:$4 sm:$0xff]  }
  0xee   :  { %2042 = vmatmul.mubr.bf16.gmra.mrb[4].mxu0 %v5892_v44  ;;  %2494 = vmatmul.mubr.bf16.gmra.mrb[4].mxu1 %v5892_v44  ;;  %v6002_v44 = vld [vmem:[#allocation4 + $0xc4] ss:$16 sps:$4 sm:$0xff]  }
  0xef   :  { %2051 = vmatprep.mubr.bf16.mxu0 %v5896_v45  ;;  %2503 = vmatprep.mubr.bf16.mxu1 %v5896_v45  ;;  %v6005_v45 = vld [vmem:[#allocation4 + $0xcc] ss:$16 sps:$4 sm:$0xff]  }
  0xf0   :  { %2117 = vmatpush1.bf16.msra.mxu0 %v5899_v46  ;;  %2568 = vmatprep.subr.bf16.mxu1 %v5928_v47  ;;  %v5959_v46 = vld [vmem:[%s6890_s0 + $0xc0] ss:$28 sps:$4 sm:$0xff]  }
  0xf1   :  { %2118 = vmatprep.subr.bf16.mxu0 %v5907_v48  ;;  %2569 = vmatpush1.bf16.msra.mxu1 %v5926_v49  ;;  %v6000_v47 = vld [vmem:[#allocation4 + $0xc0] ss:$16 sps:$4 sm:$0xff]   ;;  %v6003_v48 = vld [vmem:[#allocation4 + $0xc8] ss:$16 sps:$4 sm:$0xff]   ;;  %v6008_v49 = vld [vmem:[#allocation4 + $0xe4] ss:$16 sps:$4 sm:$0xff]  }
  0xf2   :  { %2570 = vmatprep.subr.bf16.mxu1 %v5931_v50  ;;  %v6011_v50 = vld [vmem:[#allocation4 + $0xec] ss:$16 sps:$4 sm:$0xff]  }
  0xf4   :  { %2119 = vmatpush1.bf16.msra.mxu0 %v5905_v51  ;;  %v6006_v51 = vld [vmem:[#allocation4 + $0xe0] ss:$16 sps:$4 sm:$0xff]  }
  0xf5   :  { %2120 = vmatprep.subr.bf16.mxu0 %v5913_v52  ;;  %2571 = vmatpush1.bf16.msra.mxu1 %v5929_v53  ;;  %v6009_v52 = vld [vmem:[#allocation4 + $0xe8] ss:$16 sps:$4 sm:$0xff]   ;;  %v6014_v53 = vld [vmem:[#allocation4 + $0x104] ss:$16 sps:$4 sm:$0xff]  }
  0xf6   :  { %2052 = vmatmul.mubr.bf16.gmra.mrb[8].mxu0 %v5898_v54  ;;  %2504 = vmatmul.mubr.bf16.gmra.mrb[8].mxu1 %v5898_v54  ;;  %v6017_v54 = vld [vmem:[#allocation4 + $0x10c] ss:$16 sps:$4 sm:$0xff]  }
  0xf7   :  { %2061 = vmatprep.mubr.bf16.mxu0 %v5902_v55  ;;  %2513 = vmatprep.mubr.bf16.mxu1 %v5902_v55  ;;  %v5960_v55 = vld [vmem:[%s6890_s0 + $0xf8] ss:$28 sps:$4 sm:$0xff]  }
  0xf8   :  { %2121 = vmatpush1.bf16.msra.mxu0 %v5911_v56  ;;  %2572 = vmatprep.subr.bf16.mxu1 %v5940_v57  ;;  %v6012_v56 = vld [vmem:[#allocation4 + $0x100] ss:$16 sps:$4 sm:$0xff]   ;;  %v6015_v57 = vld [vmem:[#allocation4 + $0x108] ss:$16 sps:$4 sm:$0xff]  }
  0xf9   :  { %2122 = vmatprep.subr.bf16.mxu0 %v5925_v58  ;;  %2573 = vmatpush1.bf16.msra.mxu1 %v5938_v59  ;;  %v6020_v58 = vld [vmem:[#allocation4 + $0x124] ss:$16 sps:$4 sm:$0xff]   ;;  %v6023_v59 = vld [vmem:[#allocation4 + $0x12c] ss:$16 sps:$4 sm:$0xff]  }
  0xfa   :  { %2574 = vmatprep.subr.bf16.mxu1 %v5943_v60  ;;  %v6018_v60 = vld [vmem:[#allocation4 + $0x120] ss:$16 sps:$4 sm:$0xff]  }
  0xfc   :  { %2123 = vmatpush1.bf16.msra.mxu0 %v5923_v61  ;;  %v6021_v61 = vld [vmem:[#allocation4 + $0x128] ss:$16 sps:$4 sm:$0xff]  }
  0xfd   :  { %2124 = vmatprep.subr.bf16.mxu0 %v5937_v62  ;;  %2575 = vmatpush1.bf16.msra.mxu1 %v5941_v63  ;;  %v6026_v62 = vld [vmem:[#allocation4 + $0x144] ss:$16 sps:$4 sm:$0xff]   ;;  %v6029_v63 = vld [vmem:[#allocation4 + $0x14c] ss:$16 sps:$4 sm:$0xff]  }
  0xfe   :  { %2062 = vmatmul.mubr.bf16.gmra.mrb[12].mxu0 %v5904_v0  ;;  %2514 = vmatmul.mubr.bf16.gmra.mrb[12].mxu1 %v5904_v0  ;;  %v5961_v0 = vld [vmem:[%s6890_s0 + $0x130] ss:$28 sps:$4 sm:$0xff]  }
  0xff   :  { %2071 = vmatprep.mubr.bf16.mxu0 %v5908_v1  ;;  %2523 = vmatprep.mubr.bf16.mxu1 %v5908_v1  ;;  %v6024_v1 = vld [vmem:[#allocation4 + $0x140] ss:$16 sps:$4 sm:$0xff]  }
 0x100   :  { %2125 = vmatpush1.bf16.msra.mxu0 %v5935_v2  ;;  %2576 = vmatprep.subr.bf16.mxu1 %v5952_v3  ;;  %v6027_v2 = vld [vmem:[#allocation4 + $0x148] ss:$16 sps:$4 sm:$0xff]   ;;  %v6032_v3 = vld [vmem:[#allocation4 + $0x164] ss:$16 sps:$4 sm:$0xff]  }
 0x101   :  { %2126 = vmatprep.subr.bf16.mxu0 %v5949_v4  ;;  %2577 = vmatpush1.bf16.msra.mxu1 %v5950_v5  ;;  %v6035_v4 = vld [vmem:[#allocation4 + $0x16c] ss:$16 sps:$4 sm:$0xff]   ;;  %v6030_v5 = vld [vmem:[#allocation4 + $0x160] ss:$16 sps:$4 sm:$0xff]  }
 0x102   :  { %2578 = vmatprep.subr.bf16.mxu1 %v5955_v6  ;;  %v6033_v6 = vld [vmem:[#allocation4 + $0x168] ss:$16 sps:$4 sm:$0xff]  }
 0x104   :  { %2127 = vmatpush1.bf16.msra.mxu0 %v5947_v7  ;;  %v6038_v7 = vld [vmem:[#allocation4 + $0x184] ss:$16 sps:$4 sm:$0xff]  }
 0x105   :  { %2579 = vmatpush1.bf16.msra.mxu1 %v5953_v8  ;;  %3563 = vmatprep.subr.bf16.mxu0 %v5966_v9  ;;  %v6041_v8 = vld [vmem:[#allocation4 + $0x18c] ss:$16 sps:$4 sm:$0xff]   ;;  %v5962_v9 = vld [vmem:[%s6890_s0 + $0x168] ss:$28 sps:$4 sm:$0xff]  }
 0x106   :  { %2072 = vmatmul.mubr.bf16.gmra.mrb[16].mxu0 %v5910_v10  ;;  %2524 = vmatmul.mubr.bf16.gmra.mrb[16].mxu1 %v5910_v10  ;;  %v6036_v10 = vld [vmem:[#allocation4 + $0x180] ss:$16 sps:$4 sm:$0xff]  }
 0x107   :  { %2081 = vmatprep.mubr.bf16.mxu0 %v5920_v11  ;;  %2533 = vmatprep.mubr.bf16.mxu1 %v5920_v11  ;;  %v6039_v11 = vld [vmem:[#allocation4 + $0x188] ss:$16 sps:$4 sm:$0xff]  }
 0x108   :  { %3789 = vmatprep.subr.bf16.mxu1 %v5969_v12  ;;  %v6044_v12 = vld [vmem:[#allocation4 + $0x1a4] ss:$16 sps:$4 sm:$0xff]  }
 0x10e   :  { %2082 = vmatmul.mubr.bf16.gmra.mrb[20].mxu0 %v5922_v13  ;;  %2534 = vmatmul.mubr.bf16.gmra.mrb[20].mxu1 %v5922_v13  ;;  %v6047_v13 = vld [vmem:[#allocation4 + $0x1ac] ss:$16 sps:$4 sm:$0xff]  }
 0x10f   :  { %2091 = vmatprep.mubr.bf16.mxu0 %v5932_v14  ;;  %2543 = vmatprep.mubr.bf16.mxu1 %v5932_v14  ;;  %v6042_v14 = vld [vmem:[#allocation4 + $0x1a0] ss:$16 sps:$4 sm:$0xff]  }
 0x116   :  { %2092 = vmatmul.mubr.bf16.gmra.mrb[24].mxu0 %v5934_v15  ;;  %2544 = vmatmul.mubr.bf16.gmra.mrb[24].mxu1 %v5934_v15  ;;  %v6045_v15 = vld [vmem:[#allocation4 + $0x1a8] ss:$16 sps:$4 sm:$0xff]  }
 0x117   :  { %2101 = vmatprep.mubr.bf16.mxu0 %v5944_v16  ;;  %2553 = vmatprep.mubr.bf16.mxu1 %v5944_v16  ;;  %v5963_v16 = vld [vmem:[%s6890_s0 + $0x1a0] ss:$28 sps:$4 sm:$0xff]  }
 0x11e   :  { %2102 = vmatmul.mubr.bf16.gmra.mrb[28].mxu0 %v5946_v17  ;;  %2554 = vmatmul.mubr.bf16.gmra.mrb[28].mxu1 %v5946_v17  ;;  %v6050_v17 = vld [vmem:[#allocation4 + $0x1c4] ss:$16 sps:$4 sm:$0xff]  }
 0x11f   :  { %2144 = vmatprep.mubr.bf16.mxu0 %v6240_v18  ;;  %2596 = vmatprep.mubr.bf16.mxu1 %v6240_v18 }
 0x126   :  { %2145 = vmatmul.mubr.bf16.vlgmr.msra.gmra.mrb[0].mxu0 %v5956_v19  ;;  %2597 = vmatmul.mubr.bf16.vlgmr.msra.gmra.mrb[0].mxu1 %v5956_v19  ;;  %v6053_v19 = vld [vmem:[#allocation4 + $0x1cc] ss:$16 sps:$4 sm:$0xff]  }
 0x127   :  { %2154 = vmatprep.mubr.bf16.mxu0 %v6240_v18  ;;  %2606 = vmatprep.mubr.bf16.mxu1 %v6240_v18 }
 0x128   :  { %3564 = vmatpush1.bf16.msra.mxu0 %v5964_v20  ;;  %3790 = vmatpush1.bf16.msra.mxu1 %v5967_v21  ;;  %v6048_v20 = vld [vmem:[#allocation4 + $0x1c0] ss:$16 sps:$4 sm:$0xff]   ;;  %v6051_v21 = vld [vmem:[#allocation4 + $0x1c8] ss:$16 sps:$4 sm:$0xff]  }
 0x129   :  { %3565 = vmatprep.subr.bf16.mxu0 %v5972_v22  ;;  %3791 = vmatprep.subr.bf16.mxu1 %v5975_v23  ;;  %v6059_v22 = vld [vmem:[#allocation4 + $0x1ec] ss:$16 sps:$4 sm:$0xff]   ;;  %v6054_v23 = vld [vmem:[#allocation4 + $0x1e0] ss:$16 sps:$4 sm:$0xff]  }
 0x12c   :  { %3566 = vmatpush1.bf16.msra.mxu0 %v5970_v24  ;;  %3792 = vmatpush1.bf16.msra.mxu1 %v5973_v25  ;;  %v6057_v24 = vld [vmem:[#allocation4 + $0x1e8] ss:$16 sps:$4 sm:$0xff]   ;;  %v6062_v25 = vld [vmem:[#allocation4 + $0x204] ss:$16 sps:$4 sm:$0xff]  }
 0x12d   :  { %3567 = vmatprep.subr.bf16.mxu0 %v5978_v26  ;;  %3793 = vmatprep.subr.bf16.mxu1 %v5981_v27  ;;  %v6065_v26 = vld [vmem:[#allocation4 + $0x20c] ss:$16 sps:$4 sm:$0xff]   ;;  %v345_v27 = vlaneseq }
 0x12e   :  { %2155 = vmatmul.mubr.bf16.gmra.mrb[4].mxu0 %v5957_v28  ;;  %2607 = vmatmul.mubr.bf16.gmra.mrb[4].mxu1 %v5957_v28 }
 0x12f   :  { %2164 = vmatprep.mubr.bf16.mxu0 %v6240_v18  ;;  %2616 = vmatprep.mubr.bf16.mxu1 %v6240_v18  ;;  %v6489_v28 = vshrl.u32 %v345_v27, 7 }
 0x130   :  { %3568 = vmatpush1.bf16.msra.mxu0 %v5976_v29  ;;  %3794 = vmatpush1.bf16.msra.mxu1 %v5979_v30 }
 0x131   :  { %3569 = vmatprep.subr.bf16.mxu0 %v5984_v31  ;;  %3795 = vmatprep.subr.bf16.mxu1 %v5987_v32  ;;  %v347_v29 = vsub.s32 0, %v6489_v28  ;;  %v355_v30 = vsub.s32 2, %v6489_v28  ;;  %v343_v31 = vld [vmem:[%s6892_s2] sm:$0xf]  ;;  %v351_v32 = vsub.s32 1, %v6489_v28 }
 0x134   :  { %3570 = vmatpush1.bf16.msra.mxu0 %v5982_v33  ;;  %3796 = vmatpush1.bf16.msra.mxu1 %v5985_v34  ;;  %v359_v33 = vsub.s32 3, %v6489_v28  ;;  %v6500_v34 = vrot.slane %v343_v31, %v347_v29 }
 0x135   :  { %3571 = vmatprep.subr.bf16.mxu0 %v5990_v35  ;;  %3797 = vmatprep.subr.bf16.mxu1 %v5993_v36  ;;  %v6504_v35 = vrot.slane %v343_v31, %v355_v30  ;;  %v6508_v36 = vrot.slane %v343_v31, %v351_v32 }
 0x136   :  { %2165 = vmatmul.mubr.bf16.gmra.mrb[8].mxu0 %v5958_v37  ;;  %2617 = vmatmul.mubr.bf16.gmra.mrb[8].mxu1 %v5958_v37  ;;  %v6512_v37 = vrot.slane %v343_v31, %v359_v33 }
 0x137   :  { %2174 = vmatprep.mubr.bf16.mxu0 %v6240_v18  ;;  %2626 = vmatprep.mubr.bf16.mxu1 %v6240_v18 }
 0x138   :  { %3572 = vmatpush1.bf16.msra.mxu0 %v5988_v38  ;;  %3798 = vmatpush1.bf16.msra.mxu1 %v5991_v39 }
 0x139   :  { %3573 = vmatprep.subr.bf16.mxu0 %v5996_v40  ;;  %3799 = vmatprep.subr.bf16.mxu1 %v5999_v41 }
 0x13c   :  { %3574 = vmatpush1.bf16.msra.mxu0 %v5994_v42  ;;  %3800 = vmatpush1.bf16.msra.mxu1 %v5997_v43 }
 0x13d   :  { %3575 = vmatprep.subr.bf16.mxu0 %v6002_v44  ;;  %3801 = vmatprep.subr.bf16.mxu1 %v6005_v45 }
 0x13e   :  { %2175 = vmatmul.mubr.bf16.gmra.mrb[12].mxu0 %v5959_v46  ;;  %2627 = vmatmul.mubr.bf16.gmra.mrb[12].mxu1 %v5959_v46 }
 0x13f   :  { %2184 = vmatprep.mubr.bf16.mxu0 %v6240_v18  ;;  %2636 = vmatprep.mubr.bf16.mxu1 %v6240_v18 }
 0x140   :  { %3576 = vmatpush1.bf16.msra.mxu0 %v6000_v47  ;;  %3802 = vmatpush1.bf16.msra.mxu1 %v6003_v48 }
 0x141   :  { %3577 = vmatprep.subr.bf16.mxu0 %v6008_v49  ;;  %3803 = vmatprep.subr.bf16.mxu1 %v6011_v50 }
 0x144   :  { %3578 = vmatpush1.bf16.msra.mxu0 %v6006_v51  ;;  %3804 = vmatpush1.bf16.msra.mxu1 %v6009_v52 }
 0x145   :  { %3579 = vmatprep.subr.bf16.mxu0 %v6014_v53  ;;  %3805 = vmatprep.subr.bf16.mxu1 %v6017_v54 }
 0x146   :  { %2185 = vmatmul.mubr.bf16.gmra.mrb[16].mxu0 %v5960_v55  ;;  %2637 = vmatmul.mubr.bf16.gmra.mrb[16].mxu1 %v5960_v55 }
 0x147   :  { %2194 = vmatprep.mubr.bf16.mxu0 %v6240_v18  ;;  %2646 = vmatprep.mubr.bf16.mxu1 %v6240_v18 }
 0x148   :  { %3580 = vmatpush1.bf16.msra.mxu0 %v6012_v56  ;;  %3806 = vmatpush1.bf16.msra.mxu1 %v6015_v57 }
 0x149   :  { %3581 = vmatprep.subr.bf16.mxu0 %v6020_v58  ;;  %3807 = vmatprep.subr.bf16.mxu1 %v6023_v59 }
 0x14c   :  { %3582 = vmatpush1.bf16.msra.mxu0 %v6018_v60  ;;  %3808 = vmatpush1.bf16.msra.mxu1 %v6021_v61 }
 0x14d   :  { %3583 = vmatprep.subr.bf16.mxu0 %v6026_v62  ;;  %3809 = vmatprep.subr.bf16.mxu1 %v6029_v63 }
 0x14e   :  { %2195 = vmatmul.mubr.bf16.gmra.mrb[20].mxu0 %v5961_v0  ;;  %2647 = vmatmul.mubr.bf16.gmra.mrb[20].mxu1 %v5961_v0 }
 0x14f   :  { %2204 = vmatprep.mubr.bf16.mxu0 %v6240_v18  ;;  %2656 = vmatprep.mubr.bf16.mxu1 %v6240_v18 }
 0x150   :  { %3584 = vmatpush1.bf16.msra.mxu0 %v6024_v1  ;;  %3810 = vmatpush1.bf16.msra.mxu1 %v6027_v2 }
 0x151   :  { %3585 = vmatprep.subr.bf16.mxu0 %v6032_v3  ;;  %3811 = vmatprep.subr.bf16.mxu1 %v6035_v4  ;;  %v6060_v4 = vld [vmem:[#allocation4 + $0x200] ss:$16 sps:$4 sm:$0xff]  }
 0x154   :  { %3586 = vmatpush1.bf16.msra.mxu0 %v6030_v5  ;;  %3812 = vmatpush1.bf16.msra.mxu1 %v6033_v6  ;;  %v6063_v5 = vld [vmem:[#allocation4 + $0x208] ss:$16 sps:$4 sm:$0xff]  }
 0x155   :  { %3587 = vmatprep.subr.bf16.mxu0 %v6038_v7  ;;  %3813 = vmatprep.subr.bf16.mxu1 %v6041_v8 }
 0x156   :  { %2205 = vmatmul.mubr.bf16.gmra.mrb[24].mxu0 %v5962_v9  ;;  %2657 = vmatmul.mubr.bf16.gmra.mrb[24].mxu1 %v5962_v9 }
 0x157   :  { %2214 = vmatprep.mubr.bf16.mxu0 %v6240_v18  ;;  %2666 = vmatprep.mubr.bf16.mxu1 %v6240_v18  ;;  %v6056_v18 = vld [vmem:[#allocation4 + $0x1e4] ss:$16 sps:$4 sm:$0xff]  }
 0x158   :  { %3588 = vmatpush1.bf16.msra.mxu0 %v6036_v10  ;;  %3814 = vmatpush1.bf16.msra.mxu1 %v6039_v11  ;;  %v6068_v10 = vld [vmem:[#allocation4 + $0x224] ss:$16 sps:$4 sm:$0xff]   ;;  %v6071_v11 = vld [vmem:[#allocation4 + $0x22c] ss:$16 sps:$4 sm:$0xff]  }
 0x159   :  { %3589 = vmatprep.subr.bf16.mxu0 %v6044_v12  ;;  %3815 = vmatprep.subr.bf16.mxu1 %v6047_v13 }
 0x15c   :  { %3590 = vmatpush1.bf16.msra.mxu0 %v6042_v14  ;;  %3816 = vmatpush1.bf16.msra.mxu1 %v6045_v15 }
 0x15d   :  { %3591 = vmatprep.subr.bf16.mxu0 %v6050_v17  ;;  %3817 = vmatprep.subr.bf16.mxu1 %v6053_v19 }
 0x15e   :  { %2215 = vmatmul.mubr.bf16.gmra.mrb[28].mxu0 %v5963_v16  ;;  %2667 = vmatmul.mubr.bf16.gmra.mrb[28].mxu1 %v5963_v16 }
 0x160   :  { %3592 = vmatpush1.bf16.msra.mxu0 %v6048_v20  ;;  %3818 = vmatpush1.bf16.msra.mxu1 %v6051_v21 }
 0x161   :  { %3593 = vmatprep.subr.bf16.mxu0 %v6056_v18  ;;  %3819 = vmatprep.subr.bf16.mxu1 %v6059_v22  ;;  %v6066_v22 = vld [vmem:[#allocation4 + $0x220] ss:$16 sps:$4 sm:$0xff]  }
 0x164   :  { %3594 = vmatpush1.bf16.msra.mxu0 %v6054_v23  ;;  %3820 = vmatpush1.bf16.msra.mxu1 %v6057_v24  ;;  %v6069_v23 = vld [vmem:[#allocation4 + $0x228] ss:$16 sps:$4 sm:$0xff]   ;;  %v6074_v24 = vld [vmem:[#allocation4 + $0x244] ss:$16 sps:$4 sm:$0xff]  }
 0x165   :  { %3676 = vmatprep.subr.bf16.mxu0 %v6062_v25  ;;  %3902 = vmatprep.subr.bf16.mxu1 %v6065_v26 }
 0x1f9   :  { %v2146_v38 = vpop.f32.mrb[0].mxu0  ;;  %v2598_v39 = vpop.f32.mrb[0].mxu1 }
 0x1fa   :  { %v5159_v40 = vadd.f32 %v2146_v38, %v6500_v34  ;;  %v5191_v41 = vadd.f32 %v2598_v39, %v6504_v35  ;;  %v2148_v42 = vpop.f32.mrb[1].mxu0  ;;  %v2600_v43 = vpop.f32.mrb[1].mxu1  ;;  %v6077_v38 = vld [vmem:[#allocation4 + $0x24c] ss:$16 sps:$4 sm:$0xff]  }
 0x1fb   :  { %v5160_v44 = vadd.f32 %v2148_v42, %v6508_v36  ;;  %v5192_v45 = vadd.f32 %v2600_v43, %v6512_v37  ;;  %v2150_v46 = vpop.f32.mrb[2].mxu0  ;;  %v2602_v47 = vpop.f32.mrb[2].mxu1 }
 0x1fc   :  { %v5161_v48 = vadd.f32 %v2150_v46, %v6500_v34  ;;  %v5193_v49 = vadd.f32 %v2602_v47, %v6504_v35  ;;  %v2152_v50 = vpop.f32.mrb[3].mxu0  ;;  %v2604_v51 = vpop.f32.mrb[3].mxu1  ;;  %v2677_v54 = vmax.f32 %v5159_v40, 0.0  ;;  %v2679_v55 = vmax.f32 %v5191_v41, 0.0 }
 0x1fd   :  { %v5162_v52 = vadd.f32 %v2152_v50, %v6508_v36  ;;  %v5194_v53 = vadd.f32 %v2604_v51, %v6512_v37  ;;  %v2678_v58 = vmax.f32 %v5160_v44, 0.0  ;;  %v2680_v59 = vmax.f32 %v5192_v45, 0.0  ;;  %v6075_v50 = vld [vmem:[#allocation4 + $0x248] ss:$16 sps:$4 sm:$0xff]  }
 0x1fe   :  { %v2681_v56 = vmax.f32 %v5161_v48, 0.0  ;;  %v2683_v57 = vmax.f32 %v5193_v49, 0.0  ;;  %v6072_v49 = vld [vmem:[#allocation4 + $0x240] ss:$16 sps:$4 sm:$0xff]  }
 0x1ff   :  { %v2682_v60 = vmax.f32 %v5162_v52, 0.0  ;;  %v2684_v61 = vmax.f32 %v5194_v53, 0.0 }
 0x200   :  { %v2741_v62 = vpack.c.bf16 %v2681_v56, %v2677_v54  ;;  %v6522_v63 = vpack.c.bf16 %v2683_v57, %v2679_v55  ;;  %v6080_v55 = vld [vmem:[#allocation4 + $0x264] ss:$16 sps:$4 sm:$0xff]   ;;  %v6083_v56 = vld [vmem:[#allocation4 + $0x26c] ss:$16 sps:$4 sm:$0xff]  }
 0x201   :  { %v2742_v0 = vpack.c.bf16 %v2682_v60, %v2678_v58  ;;  %v6524_v1 = vpack.c.bf16 %v2684_v61, %v2680_v59  ;;  %v2156_v2 = vpop.f32.mrb[4].mxu0  ;;  %v2608_v3 = vpop.f32.mrb[4].mxu1 }
 0x202   :  { %v5163_v6 = vadd.f32 %v2156_v2, %v6500_v34  ;;  %v5195_v7 = vadd.f32 %v2608_v3, %v6504_v35  ;;  %v2158_v8 = vpop.f32.mrb[5].mxu0  ;;  %v2610_v9 = vpop.f32.mrb[5].mxu1 }
 0x203   :  { %v5164_v12 = vadd.f32 %v2158_v8, %v6508_v36  ;;  %v5196_v13 = vadd.f32 %v2610_v9, %v6512_v37  ;;  %v2160_v14 = vpop.f32.mrb[6].mxu0  ;;  %v2612_v15 = vpop.f32.mrb[6].mxu1  ;;  %3595 = vmatprep.mubr.bf16.mxu0 %v2742_v0  ;;  %3821 = vmatprep.mubr.bf16.mxu1 %v2742_v0 }
 0x204   :  { %v5165_v16 = vadd.f32 %v2160_v14, %v6500_v34  ;;  %v5197_v17 = vadd.f32 %v2612_v15, %v6504_v35  ;;  %v2162_v19 = vpop.f32.mrb[7].mxu0  ;;  %v2614_v20 = vpop.f32.mrb[7].mxu1  ;;  %3596 = vmatmul.mubr.bf16.vlgmr.msra.gmra.mrb[32].mxu0 %v2741_v62  ;;  %3822 = vmatmul.mubr.bf16.vlgmr.msra.gmra.mrb[32].mxu1 %v2741_v62  ;;  %v2685_v25 = vmax.f32 %v5163_v6, 0.0  ;;  %v2687_v26 = vmax.f32 %v5195_v7, 0.0  ;;  %v6081_v6 = vld [vmem:[#allocation4 + $0x268] ss:$16 sps:$4 sm:$0xff]  }
 0x205   :  { %v5166_v21 = vadd.f32 %v2162_v19, %v6508_v36  ;;  %v5198_v18 = vadd.f32 %v2614_v20, %v6512_v37  ;;  %3677 = vmatpush1.bf16.msra.mxu0 %v6060_v4  ;;  %3903 = vmatpush1.bf16.msra.mxu1 %v6063_v5  ;;  %v2686_v39 = vmax.f32 %v5164_v12, 0.0  ;;  %v2688_v40 = vmax.f32 %v5196_v13, 0.0  ;;  %v6078_v5 = vld [vmem:[#allocation4 + $0x260] ss:$16 sps:$4 sm:$0xff]   ;;  %v6086_v7 = vld [vmem:[#allocation4 + $0x284] ss:$16 sps:$4 sm:$0xff]  }
 0x206   :  { %v2689_v27 = vmax.f32 %v5165_v16, 0.0  ;;  %v2691_v31 = vmax.f32 %v5197_v17, 0.0  ;;  %3678 = vmatprep.subr.bf16.mxu0 %v6068_v10  ;;  %3904 = vmatprep.subr.bf16.mxu1 %v6071_v11  ;;  %v6089_v12 = vld [vmem:[#allocation4 + $0x28c] ss:$16 sps:$4 sm:$0xff]  }
 0x207   :  { %v2690_v41 = vmax.f32 %v5166_v21, 0.0  ;;  %v2692_v42 = vmax.f32 %v5198_v18, 0.0 }
 0x208   :  { %v2745_v43 = vpack.c.bf16 %v2689_v27, %v2685_v25  ;;  %v6534_v44 = vpack.c.bf16 %v2691_v31, %v2687_v26 }
 0x209   :  { %v2746_v45 = vpack.c.bf16 %v2690_v41, %v2686_v39  ;;  %v6536_v46 = vpack.c.bf16 %v2692_v42, %v2688_v40  ;;  %v2166_v47 = vpop.f32.mrb[8].mxu0  ;;  %v2618_v48 = vpop.f32.mrb[8].mxu1  ;;  %3679 = vmatpush1.bf16.msra.mxu0 %v6066_v22  ;;  %3905 = vmatpush1.bf16.msra.mxu1 %v6069_v23  ;;  %v6084_v23 = vld [vmem:[#allocation4 + $0x280] ss:$16 sps:$4 sm:$0xff]   ;;  %v6095_v39 = vld [vmem:[#allocation4 + $0x2ac] ss:$16 sps:$4 sm:$0xff]  }
 0x20a   :  { %v5167_v51 = vadd.f32 %v2166_v47, %v6500_v34  ;;  %v5199_v52 = vadd.f32 %v2618_v48, %v6504_v35  ;;  %v2168_v53 = vpop.f32.mrb[9].mxu0  ;;  %v2620_v54 = vpop.f32.mrb[9].mxu1  ;;  %3680 = vmatprep.subr.bf16.mxu0 %v6074_v24  ;;  %3906 = vmatprep.subr.bf16.mxu1 %v6077_v38  ;;  %v6087_v24 = vld [vmem:[#allocation4 + $0x288] ss:$16 sps:$4 sm:$0xff]   ;;  %v6092_v38 = vld [vmem:[#allocation4 + $0x2a4] ss:$16 sps:$4 sm:$0xff]  }
 0x20b   :  { %v5168_v57 = vadd.f32 %v2168_v53, %v6508_v36  ;;  %v5200_v58 = vadd.f32 %v2620_v54, %v6512_v37  ;;  %v2170_v59 = vpop.f32.mrb[10].mxu0  ;;  %v2622_v60 = vpop.f32.mrb[10].mxu1  ;;  %3605 = vmatprep.mubr.bf16.mxu0 %v2746_v45  ;;  %3831 = vmatprep.mubr.bf16.mxu1 %v2746_v45  ;;  %v6093_v53 = vld [vmem:[#allocation4 + $0x2a8] ss:$16 sps:$4 sm:$0xff]   ;;  %v6098_v54 = vld [vmem:[#allocation4 + $0x2c4] ss:$16 sps:$4 sm:$0xff]  }
 0x20c   :  { %v5169_v61 = vadd.f32 %v2170_v59, %v6500_v34  ;;  %v5201_v62 = vadd.f32 %v2622_v60, %v6504_v35  ;;  %v2172_v0 = vpop.f32.mrb[11].mxu0  ;;  %v2624_v2 = vpop.f32.mrb[11].mxu1  ;;  %3606 = vmatmul.mubr.bf16.gmra.mrb[36].mxu0 %v2745_v43  ;;  %3832 = vmatmul.mubr.bf16.gmra.mrb[36].mxu1 %v2745_v43  ;;  %v2693_v8 = vmax.f32 %v5167_v51, 0.0  ;;  %v2695_v9 = vmax.f32 %v5199_v52, 0.0  ;;  %v6090_v52 = vld [vmem:[#allocation4 + $0x2a0] ss:$16 sps:$4 sm:$0xff]  }
 0x20d   :  { %v5170_v3 = vadd.f32 %v2172_v0, %v6508_v36  ;;  %v5202_v4 = vadd.f32 %v2624_v2, %v6512_v37  ;;  %3681 = vmatpush1.bf16.msra.mxu0 %v6072_v49  ;;  %3907 = vmatpush1.bf16.msra.mxu1 %v6075_v50  ;;  %v2694_v13 = vmax.f32 %v5168_v57, 0.0  ;;  %v2696_v14 = vmax.f32 %v5200_v58, 0.0  ;;  %v6101_v59 = vld [vmem:[#allocation4 + $0x2cc] ss:$16 sps:$4 sm:$0xff]  }
 0x20e   :  { %v2697_v10 = vmax.f32 %v5169_v61, 0.0  ;;  %v2699_v11 = vmax.f32 %v5201_v62, 0.0  ;;  %3682 = vmatprep.subr.bf16.mxu0 %v6080_v55  ;;  %3908 = vmatprep.subr.bf16.mxu1 %v6083_v56 }
 0x20f   :  { %v2698_v15 = vmax.f32 %v5170_v3, 0.0  ;;  %v2700_v16 = vmax.f32 %v5202_v4, 0.0 }
 0x210   :  { %v2749_v17 = vpack.c.bf16 %v2697_v10, %v2693_v8  ;;  %v6546_v19 = vpack.c.bf16 %v2699_v11, %v2695_v9  ;;  %v6096_v8 = vld [vmem:[#allocation4 + $0x2c0] ss:$16 sps:$4 sm:$0xff]   ;;  %v6099_v9 = vld [vmem:[#allocation4 + $0x2c8] ss:$16 sps:$4 sm:$0xff]  }
 0x211   :  { %v2750_v20 = vpack.c.bf16 %v2698_v15, %v2694_v13  ;;  %v6548_v21 = vpack.c.bf16 %v2700_v16, %v2696_v14  ;;  %v2176_v18 = vpop.f32.mrb[12].mxu0  ;;  %v2628_v22 = vpop.f32.mrb[12].mxu1  ;;  %3683 = vmatpush1.bf16.msra.mxu0 %v6078_v5  ;;  %3909 = vmatpush1.bf16.msra.mxu1 %v6081_v6  ;;  %v6104_v14 = vld [vmem:[#allocation4 + $0x2e4] ss:$16 sps:$4 sm:$0xff]   ;;  %v6107_v15 = vld [vmem:[#allocation4 + $0x2ec] ss:$16 sps:$4 sm:$0xff]  }
 0x212   :  { %v5171_v25 = vadd.f32 %v2176_v18, %v6500_v34  ;;  %v5203_v26 = vadd.f32 %v2628_v22, %v6504_v35  ;;  %v2178_v27 = vpop.f32.mrb[13].mxu0  ;;  %v2630_v31 = vpop.f32.mrb[13].mxu1  ;;  %3684 = vmatprep.subr.bf16.mxu0 %v6086_v7  ;;  %3910 = vmatprep.subr.bf16.mxu1 %v6089_v12 }
 0x213   :  { %v5172_v40 = vadd.f32 %v2178_v27, %v6508_v36  ;;  %v5204_v41 = vadd.f32 %v2630_v31, %v6512_v37  ;;  %v2180_v42 = vpop.f32.mrb[14].mxu0  ;;  %v2632_v43 = vpop.f32.mrb[14].mxu1  ;;  %3615 = vmatprep.mubr.bf16.mxu0 %v2750_v20  ;;  %3841 = vmatprep.mubr.bf16.mxu1 %v2750_v20  ;;  %v6102_v31 = vld [vmem:[#allocation4 + $0x2e0] ss:$16 sps:$4 sm:$0xff]  }
 0x214   :  { %v5173_v45 = vadd.f32 %v2180_v42, %v6500_v34  ;;  %v5205_v47 = vadd.f32 %v2632_v43, %v6504_v35  ;;  %v2182_v48 = vpop.f32.mrb[15].mxu0  ;;  %v2634_v49 = vpop.f32.mrb[15].mxu1  ;;  %3616 = vmatmul.mubr.bf16.gmra.mrb[40].mxu0 %v2749_v17  ;;  %3842 = vmatmul.mubr.bf16.gmra.mrb[40].mxu1 %v2749_v17  ;;  %v2701_v55 = vmax.f32 %v5171_v25, 0.0  ;;  %v2703_v56 = vmax.f32 %v5203_v26, 0.0 }
 0x215   :  { %v5174_v50 = vadd.f32 %v2182_v48, %v6508_v36  ;;  %v5206_v51 = vadd.f32 %v2634_v49, %v6512_v37  ;;  %3685 = vmatpush1.bf16.msra.mxu0 %v6084_v23  ;;  %3911 = vmatpush1.bf16.msra.mxu1 %v6087_v24  ;;  %v2702_v60 = vmax.f32 %v5172_v40, 0.0  ;;  %v2704_v61 = vmax.f32 %v5204_v41, 0.0 }
 0x216   :  { %v2705_v57 = vmax.f32 %v5173_v45, 0.0  ;;  %v2707_v58 = vmax.f32 %v5205_v47, 0.0  ;;  %3686 = vmatprep.subr.bf16.mxu0 %v6092_v38  ;;  %3912 = vmatprep.subr.bf16.mxu1 %v6095_v39  ;;  %v6105_v38 = vld [vmem:[#allocation4 + $0x2e8] ss:$16 sps:$4 sm:$0xff]   ;;  %v6110_v39 = vld [vmem:[#allocation4 + $0x304] ss:$16 sps:$4 sm:$0xff]  }
 0x217   :  { %v2706_v62 = vmax.f32 %v5174_v50, 0.0  ;;  %v2708_v0 = vmax.f32 %v5206_v51, 0.0  ;;  %v6113_v45 = vld [vmem:[#allocation4 + $0x30c] ss:$16 sps:$4 sm:$0xff]  }
 0x218   :  { %v2753_v2 = vpack.c.bf16 %v2705_v57, %v2701_v55  ;;  %v6558_v3 = vpack.c.bf16 %v2707_v58, %v2703_v56  ;;  %v6108_v57 = vld [vmem:[#allocation4 + $0x300] ss:$16 sps:$4 sm:$0xff]   ;;  %v6111_v58 = vld [vmem:[#allocation4 + $0x308] ss:$16 sps:$4 sm:$0xff]  }
 0x219   :  { %v2754_v4 = vpack.c.bf16 %v2706_v62, %v2702_v60  ;;  %v6560_v5 = vpack.c.bf16 %v2708_v0, %v2704_v61  ;;  %v2186_v6 = vpop.f32.mrb[16].mxu0  ;;  %v2638_v7 = vpop.f32.mrb[16].mxu1  ;;  %3687 = vmatpush1.bf16.msra.mxu0 %v6090_v52  ;;  %3913 = vmatpush1.bf16.msra.mxu1 %v6093_v53  ;;  %v6116_v0 = vld [vmem:[#allocation4 + $0x324] ss:$16 sps:$4 sm:$0xff]  }
 0x21a   :  { %v5175_v10 = vadd.f32 %v2186_v6, %v6500_v34  ;;  %v5207_v11 = vadd.f32 %v2638_v7, %v6504_v35  ;;  %v2188_v12 = vpop.f32.mrb[17].mxu0  ;;  %v2640_v13 = vpop.f32.mrb[17].mxu1  ;;  %3688 = vmatprep.subr.bf16.mxu0 %v6098_v54  ;;  %3914 = vmatprep.subr.bf16.mxu1 %v6101_v59 }
 0x21b   :  { %v5176_v16 = vadd.f32 %v2188_v12, %v6508_v36  ;;  %v5208_v17 = vadd.f32 %v2640_v13, %v6512_v37  ;;  %v2190_v20 = vpop.f32.mrb[18].mxu0  ;;  %v2642_v18 = vpop.f32.mrb[18].mxu1  ;;  %3625 = vmatprep.mubr.bf16.mxu0 %v2754_v4  ;;  %3851 = vmatprep.mubr.bf16.mxu1 %v2754_v4 }
 0x21c   :  { %v5177_v22 = vadd.f32 %v2190_v20, %v6500_v34  ;;  %v5209_v23 = vadd.f32 %v2642_v18, %v6504_v35  ;;  %v2192_v24 = vpop.f32.mrb[19].mxu0  ;;  %v2644_v25 = vpop.f32.mrb[19].mxu1  ;;  %3626 = vmatmul.mubr.bf16.gmra.mrb[44].mxu0 %v2753_v2  ;;  %3852 = vmatmul.mubr.bf16.gmra.mrb[44].mxu1 %v2753_v2  ;;  %v2709_v40 = vmax.f32 %v5175_v10, 0.0  ;;  %v2711_v41 = vmax.f32 %v5207_v11, 0.0  ;;  %v6119_v2 = vld [vmem:[#allocation4 + $0x32c] ss:$16 sps:$4 sm:$0xff]  }
 0x21d   :  { %v5178_v26 = vadd.f32 %v2192_v24, %v6508_v36  ;;  %v5210_v27 = vadd.f32 %v2644_v25, %v6512_v37  ;;  %3689 = vmatpush1.bf16.msra.mxu0 %v6096_v8  ;;  %3915 = vmatpush1.bf16.msra.mxu1 %v6099_v9  ;;  %v2710_v47 = vmax.f32 %v5176_v16, 0.0  ;;  %v2712_v48 = vmax.f32 %v5208_v17, 0.0  ;;  %v6117_v16 = vld [vmem:[#allocation4 + $0x328] ss:$16 sps:$4 sm:$0xff]   ;;  %v6122_v17 = vld [vmem:[#allocation4 + $0x344] ss:$16 sps:$4 sm:$0xff]  }
 0x21e   :  { %v2713_v42 = vmax.f32 %v5177_v22, 0.0  ;;  %v2715_v43 = vmax.f32 %v5209_v23, 0.0  ;;  %3690 = vmatprep.subr.bf16.mxu0 %v6104_v14  ;;  %3916 = vmatprep.subr.bf16.mxu1 %v6107_v15  ;;  %v6114_v15 = vld [vmem:[#allocation4 + $0x320] ss:$16 sps:$4 sm:$0xff]   ;;  %v6125_v24 = vld [vmem:[#allocation4 + $0x34c] ss:$16 sps:$4 sm:$0xff]  }
 0x21f   :  { %v2714_v49 = vmax.f32 %v5178_v26, 0.0  ;;  %v2716_v50 = vmax.f32 %v5210_v27, 0.0 }
 0x220   :  { %v2757_v51 = vpack.c.bf16 %v2713_v42, %v2709_v40  ;;  %v6570_v52 = vpack.c.bf16 %v2715_v43, %v2711_v41 }
 0x221   :  { %v2758_v53 = vpack.c.bf16 %v2714_v49, %v2710_v47  ;;  %v6572_v54 = vpack.c.bf16 %v2716_v50, %v2712_v48  ;;  %v2196_v55 = vpop.f32.mrb[20].mxu0  ;;  %v2648_v56 = vpop.f32.mrb[20].mxu1  ;;  %3691 = vmatpush1.bf16.msra.mxu0 %v6102_v31  ;;  %3917 = vmatpush1.bf16.msra.mxu1 %v6105_v38  ;;  %v6123_v47 = vld [vmem:[#allocation4 + $0x348] ss:$16 sps:$4 sm:$0xff]  }
 0x222   :  { %v5179_v59 = vadd.f32 %v2196_v55, %v6500_v34  ;;  %v5211_v60 = vadd.f32 %v2648_v56, %v6504_v35  ;;  %v2198_v61 = vpop.f32.mrb[21].mxu0  ;;  %v2650_v62 = vpop.f32.mrb[21].mxu1  ;;  %3692 = vmatprep.subr.bf16.mxu0 %v6110_v39  ;;  %3918 = vmatprep.subr.bf16.mxu1 %v6113_v45  ;;  %v6120_v45 = vld [vmem:[#allocation4 + $0x340] ss:$16 sps:$4 sm:$0xff]   ;;  %v6131_v55 = vld [vmem:[#allocation4 + $0x36c] ss:$16 sps:$4 sm:$0xff]  }
 0x223   :  { %v5180_v4 = vadd.f32 %v2198_v61, %v6508_v36  ;;  %v5212_v6 = vadd.f32 %v2650_v62, %v6512_v37  ;;  %v2200_v7 = vpop.f32.mrb[22].mxu0  ;;  %v2652_v8 = vpop.f32.mrb[22].mxu1  ;;  %3635 = vmatprep.mubr.bf16.mxu0 %v2758_v53  ;;  %3861 = vmatprep.mubr.bf16.mxu1 %v2758_v53  ;;  %v6128_v53 = vld [vmem:[#allocation4 + $0x364] ss:$16 sps:$4 sm:$0xff]  }
 0x224   :  { %v5181_v9 = vadd.f32 %v2200_v7, %v6500_v34  ;;  %v5213_v10 = vadd.f32 %v2652_v8, %v6504_v35  ;;  %v2202_v11 = vpop.f32.mrb[23].mxu0  ;;  %v2654_v12 = vpop.f32.mrb[23].mxu1  ;;  %3636 = vmatmul.mubr.bf16.gmra.mrb[48].mxu0 %v2757_v51  ;;  %3862 = vmatmul.mubr.bf16.gmra.mrb[48].mxu1 %v2757_v51  ;;  %v2717_v20 = vmax.f32 %v5179_v59, 0.0  ;;  %v2719_v18 = vmax.f32 %v5211_v60, 0.0  ;;  %v6129_v7 = vld [vmem:[#allocation4 + $0x368] ss:$16 sps:$4 sm:$0xff]  }
 0x225   :  { %v5182_v13 = vadd.f32 %v2202_v11, %v6508_v36  ;;  %v5214_v14 = vadd.f32 %v2654_v12, %v6512_v37  ;;  %3693 = vmatpush1.bf16.msra.mxu0 %v6108_v57  ;;  %3919 = vmatpush1.bf16.msra.mxu1 %v6111_v58  ;;  %v2718_v25 = vmax.f32 %v5180_v4, 0.0  ;;  %v2720_v26 = vmax.f32 %v5212_v6, 0.0  ;;  %v6126_v6 = vld [vmem:[#allocation4 + $0x360] ss:$16 sps:$4 sm:$0xff]   ;;  %v6134_v8 = vld [vmem:[#allocation4 + $0x384] ss:$16 sps:$4 sm:$0xff]  }
 0x226   :  { %v2721_v22 = vmax.f32 %v5181_v9, 0.0  ;;  %v2723_v23 = vmax.f32 %v5213_v10, 0.0  ;;  %3694 = vmatprep.subr.bf16.mxu0 %v6116_v0  ;;  %3920 = vmatprep.subr.bf16.mxu1 %v6119_v2 }
 0x227   :  { %v2722_v27 = vmax.f32 %v5182_v13, 0.0  ;;  %v2724_v31 = vmax.f32 %v5214_v14, 0.0  ;;  %v6137_v13 = vld [vmem:[#allocation4 + $0x38c] ss:$16 sps:$4 sm:$0xff]  }
 0x228   :  { %v2761_v38 = vpack.c.bf16 %v2721_v22, %v2717_v20  ;;  %v6582_v39 = vpack.c.bf16 %v2723_v23, %v2719_v18 }
 0x229   :  { %v2762_v40 = vpack.c.bf16 %v2722_v27, %v2718_v25  ;;  %v6584_v41 = vpack.c.bf16 %v2724_v31, %v2720_v26  ;;  %v2206_v42 = vpop.f32.mrb[24].mxu0  ;;  %v2658_v43 = vpop.f32.mrb[24].mxu1  ;;  %3695 = vmatpush1.bf16.msra.mxu0 %v6114_v15  ;;  %3921 = vmatpush1.bf16.msra.mxu1 %v6117_v16  ;;  %v6132_v26 = vld [vmem:[#allocation4 + $0x380] ss:$16 sps:$4 sm:$0xff]   ;;  %v6135_v27 = vld [vmem:[#allocation4 + $0x388] ss:$16 sps:$4 sm:$0xff]  }
 0x22a   :  { %v5183_v48 = vadd.f32 %v2206_v42, %v6500_v34  ;;  %v5215_v49 = vadd.f32 %v2658_v43, %v6504_v35  ;;  %v2208_v50 = vpop.f32.mrb[25].mxu0  ;;  %v2660_v51 = vpop.f32.mrb[25].mxu1  ;;  %3696 = vmatprep.subr.bf16.mxu0 %v6122_v17  ;;  %3922 = vmatprep.subr.bf16.mxu1 %v6125_v24  ;;  %v6140_v43 = vld [vmem:[#allocation4 + $0x3a4] ss:$16 sps:$4 sm:$0xff]  }
 0x22b   :  { %v5184_v56 = vadd.f32 %v2208_v50, %v6508_v36  ;;  %v5216_v57 = vadd.f32 %v2660_v51, %v6512_v37  ;;  %v2210_v58 = vpop.f32.mrb[26].mxu0  ;;  %v2662_v59 = vpop.f32.mrb[26].mxu1  ;;  %3645 = vmatprep.mubr.bf16.mxu0 %v2762_v40  ;;  %3871 = vmatprep.mubr.bf16.mxu1 %v2762_v40 }
 0x22c   :  { %v5185_v60 = vadd.f32 %v2210_v58, %v6500_v34  ;;  %v5217_v61 = vadd.f32 %v2662_v59, %v6504_v35  ;;  %v2212_v62 = vpop.f32.mrb[27].mxu0  ;;  %v2664_v0 = vpop.f32.mrb[27].mxu1  ;;  %3646 = vmatmul.mubr.bf16.gmra.mrb[52].mxu0 %v2761_v38  ;;  %3872 = vmatmul.mubr.bf16.gmra.mrb[52].mxu1 %v2761_v38  ;;  %v2725_v9 = vmax.f32 %v5183_v48, 0.0  ;;  %v2727_v10 = vmax.f32 %v5215_v49, 0.0  ;;  %v6138_v59 = vld [vmem:[#allocation4 + $0x3a0] ss:$16 sps:$4 sm:$0xff]  }
 0x22d   :  { %v5186_v2 = vadd.f32 %v2212_v62, %v6508_v36  ;;  %v5218_v4 = vadd.f32 %v2664_v0, %v6512_v37  ;;  %3697 = vmatpush1.bf16.msra.mxu0 %v6120_v45  ;;  %3923 = vmatpush1.bf16.msra.mxu1 %v6123_v47  ;;  %v2726_v14 = vmax.f32 %v5184_v56, 0.0  ;;  %v2728_v15 = vmax.f32 %v5216_v57, 0.0  ;;  %v6143_v45 = vld [vmem:[#allocation4 + $0x3ac] ss:$16 sps:$4 sm:$0xff]  }
 0x22e   :  { %v2729_v11 = vmax.f32 %v5185_v60, 0.0  ;;  %v2731_v12 = vmax.f32 %v5217_v61, 0.0  ;;  %3698 = vmatprep.subr.bf16.mxu0 %v6128_v53  ;;  %3924 = vmatprep.subr.bf16.mxu1 %v6131_v55  ;;  %v6141_v60 = vld [vmem:[#allocation4 + $0x3a8] ss:$16 sps:$4 sm:$0xff]   ;;  %v6146_v61 = vld [vmem:[#allocation4 + $0x3c4] ss:$16 sps:$4 sm:$0xff]  }
 0x22f   :  { %v2730_v16 = vmax.f32 %v5186_v2, 0.0  ;;  %v2732_v17 = vmax.f32 %v5218_v4, 0.0 }
 0x230   :  { %v2765_v20 = vpack.c.bf16 %v2729_v11, %v2725_v9  ;;  %v6594_v18 = vpack.c.bf16 %v2731_v12, %v2727_v10  ;;  %v6144_v11 = vld [vmem:[#allocation4 + $0x3c0] ss:$16 sps:$4 sm:$0xff]   ;;  %v6147_v12 = vld [vmem:[#allocation4 + $0x3c8] ss:$16 sps:$4 sm:$0xff]  }
 0x231   :  { %v2766_v22 = vpack.c.bf16 %v2730_v16, %v2726_v14  ;;  %v6596_v23 = vpack.c.bf16 %v2732_v17, %v2728_v15  ;;  %v2216_v24 = vpop.f32.mrb[28].mxu0  ;;  %v2668_v25 = vpop.f32.mrb[28].mxu1  ;;  %3699 = vmatpush1.bf16.msra.mxu0 %v6126_v6  ;;  %3925 = vmatpush1.bf16.msra.mxu1 %v6129_v7  ;;  %v6155_v14 = vld [vmem:[#allocation4 + $0x3ec] ss:$16 sps:$4 sm:$0xff]   ;;  %v6150_v15 = vld [vmem:[#allocation4 + $0x3e0] ss:$16 sps:$4 sm:$0xff]  }
 0x232   :  { %v5187_v31 = vadd.f32 %v2216_v24, %v6500_v34  ;;  %v5219_v38 = vadd.f32 %v2668_v25, %v6504_v35  ;;  %v2218_v40 = vpop.f32.mrb[29].mxu0  ;;  %v2670_v42 = vpop.f32.mrb[29].mxu1  ;;  %3700 = vmatprep.subr.bf16.mxu0 %v6134_v8  ;;  %3926 = vmatprep.subr.bf16.mxu1 %v6137_v13  ;;  %v6152_v13 = vld [vmem:[#allocation4 + $0x3e4] ss:$16 sps:$4 sm:$0xff]   ;;  %v6153_v16 = vld [vmem:[#allocation4 + $0x3e8] ss:$16 sps:$4 sm:$0xff]  }
 0x233   :  { %v5188_v47 = vadd.f32 %v2218_v40, %v6508_v36  ;;  %v5220_v48 = vadd.f32 %v2670_v42, %v6512_v37  ;;  %v2220_v49 = vpop.f32.mrb[30].mxu0  ;;  %v2672_v50 = vpop.f32.mrb[30].mxu1  ;;  %3655 = vmatprep.mubr.bf16.mxu0 %v2766_v22  ;;  %3881 = vmatprep.mubr.bf16.mxu1 %v2766_v22  ;;  %v6156_v17 = vld [vmem:[%s6895_s5 + $0x40] sm:$0xff]   ;;  %v6160_v24 = vld [vmem:[%s6895_s5 + $0x48] sm:$0xff]   ;;  %v6168_v40 = vld [vmem:[%s6895_s5 + $0x58] sm:$0xff]  }
 0x234   :  { %v5189_v51 = vadd.f32 %v2220_v49, %v6500_v34  ;;  %v5221_v53 = vadd.f32 %v2672_v50, %v6504_v35  ;;  %v2222_v55 = vpop.f32.mrb[31].mxu0  ;;  %v2674_v56 = vpop.f32.mrb[31].mxu1  ;;  %3656 = vmatmul.mubr.bf16.gmra.mrb[56].mxu0 %v2765_v20  ;;  %3882 = vmatmul.mubr.bf16.gmra.mrb[56].mxu1 %v2765_v20  ;;  %v2733_v62 = vmax.f32 %v5187_v31, 0.0  ;;  %v2735_v0 = vmax.f32 %v5219_v38, 0.0  ;;  %v6149_v34 = vld [vmem:[#allocation4 + $0x3cc] ss:$16 sps:$4 sm:$0xff]  }
 0x235   :  { %v5190_v57 = vadd.f32 %v2222_v55, %v6508_v36  ;;  %v5222_v58 = vadd.f32 %v2674_v56, %v6512_v37  ;;  %3701 = vmatpush1.bf16.msra.mxu0 %v6132_v26  ;;  %3927 = vmatpush1.bf16.msra.mxu1 %v6135_v27  ;;  %v2734_v35 = vmax.f32 %v5188_v47, 0.0  ;;  %v2736_v6 = vmax.f32 %v5220_v48, 0.0  ;;  %v6158_v20 = vld [vmem:[%s6895_s5 + $0xc0] sm:$0xff]   ;;  %v6162_v25 = vld [vmem:[%s6895_s5 + $0xc8] sm:$0xff]   ;;  %v6164_v31 = vld [vmem:[%s6895_s5 + $0x50] sm:$0xff]  }
 0x236   :  { %v2737_v2 = vmax.f32 %v5189_v51, 0.0  ;;  %v2739_v4 = vmax.f32 %v5221_v53, 0.0  ;;  %3702 = vmatprep.subr.bf16.mxu0 %v6140_v43  ;;  %3928 = vmatprep.subr.bf16.mxu1 %v6143_v45  ;;  %v6157_v22 = vld [vmem:[%s6895_s5] sm:$0xff]   ;;  %v6161_v26 = vld [vmem:[%s6895_s5 + $0x8] sm:$0xff]   ;;  %v6167_v38 = vld [vmem:[%s6895_s5 + $0x90] sm:$0xff]  }
 0x237   :  { %v2738_v7 = vmax.f32 %v5190_v57, 0.0  ;;  %v2740_v8 = vmax.f32 %v5222_v58, 0.0  ;;  %v6163_v27 = vld [vmem:[%s6895_s5 + $0x88] sm:$0xff]   ;;  %v6170_v42 = vld [vmem:[%s6895_s5 + $0xd8] sm:$0xff]   ;;  %v6172_v47 = vld [vmem:[%s6895_s5 + $0x60] sm:$0xff]  }
 0x238   :  { %v2769_v9 = vpack.c.bf16 %v2737_v2, %v2733_v62  ;;  %v6606_v36 = vpack.c.bf16 %v2739_v4, %v2735_v0  ;;  %v6169_v43 = vld [vmem:[%s6895_s5 + $0x18] sm:$0xff]   ;;  %v6175_v48 = vld [vmem:[%s6895_s5 + $0xa0] sm:$0xff]   ;;  %v6176_v49 = vld [vmem:[%s6895_s5 + $0x68] sm:$0xff]  }
 0x239   :  { %v2770_v37 = vpack.c.bf16 %v2738_v7, %v2734_v35  ;;  %v6608_v10 = vpack.c.bf16 %v2740_v8, %v2736_v6  ;;  %3703 = vmatpush1.bf16.msra.mxu0 %v6138_v59  ;;  %3929 = vmatpush1.bf16.msra.mxu1 %v6141_v60  ;;  %v6171_v45 = vld [vmem:[%s6895_s5 + $0x98] sm:$0xff]   ;;  %v6178_v50 = vld [vmem:[%s6895_s5 + $0xe8] sm:$0xff]   ;;  %v6180_v55 = vld [vmem:[%s6895_s5 + $0x70] sm:$0xff]  }
 0x23a   :  { %3704 = vmatprep.subr.bf16.mxu0 %v6146_v61  ;;  %3930 = vmatprep.subr.bf16.mxu1 %v6149_v34  ;;  %v6177_v51 = vld [vmem:[%s6895_s5 + $0x28] sm:$0xff]   ;;  %v6183_v56 = vld [vmem:[%s6895_s5 + $0xb0] sm:$0xff]  }
 0x23b   :  { %3665 = vmatprep.mubr.bf16.mxu0 %v2770_v37  ;;  %3891 = vmatprep.mubr.bf16.mxu1 %v2770_v37  ;;  %v6179_v53 = vld [vmem:[%s6895_s5 + $0xa8] sm:$0xff]  }
 0x23c   :  { %3666 = vmatmul.mubr.bf16.gmra.mrb[60].mxu0 %v2769_v9  ;;  %3892 = vmatmul.mubr.bf16.gmra.mrb[60].mxu1 %v2769_v9 }
 0x23d   :  { %3705 = vmatpush1.bf16.msra.mxu0 %v6144_v11  ;;  %3708 = vmatprep.mubr.bf16.mxu0 %v6524_v1 }
 0x23e   :  { %3931 = vmatpush1.bf16.msra.mxu1 %v6147_v12  ;;  %3934 = vmatprep.mubr.bf16.mxu1 %v6524_v1  ;;  %v6159_v1 = vld [vmem:[%s6895_s5 + $0x80] sm:$0xff]  }
 0x23f   :  { %3706 = vmatprep.subr.bf16.mxu0 %v6152_v13  ;;  %3932 = vmatprep.subr.bf16.mxu1 %v6155_v14 }
 0x241   :  { %3707 = vmatpush1.bf16.msra.mxu0 %v6150_v15 }
 0x242   :  { %3933 = vmatpush1.bf16.msra.mxu1 %v6153_v16  ;;  %5031 = vmatprep.subr.bf16.mxu0 %v6156_v17 }
 0x243   :  { %5095 = vmatprep.subr.bf16.mxu1 %v6158_v20 }
 0x244   :  { %3709 = vmatmul.mubr.bf16.vlgmr.msra.gmra.mrb[32].mxu0 %v6522_v63 }
 0x245   :  { %3935 = vmatmul.mubr.bf16.vlgmr.msra.gmra.mrb[32].mxu1 %v6522_v63  ;;  %3718 = vmatprep.mubr.bf16.mxu0 %v6536_v46  ;;  %v6166_v63 = vld [vmem:[%s6895_s5 + $0xd0] sm:$0xff]  }
 0x246   :  { %3944 = vmatprep.mubr.bf16.mxu1 %v6536_v46  ;;  %5032 = vmatpush3.bf16.msra.mxu0 %v6157_v22  ;;  %v6165_v46 = vld [vmem:[%s6895_s5 + $0x10] sm:$0xff]  }
 0x247   :  { %5096 = vmatpush3.bf16.msra.mxu1 %v6159_v1  ;;  %5033 = vmatprep.subr.bf16.mxu0 %v6160_v24 }
 0x248   :  { %5097 = vmatprep.subr.bf16.mxu1 %v6162_v25 }
 0x24a   :  { %5034 = vmatpush3.bf16.msra.mxu0 %v6161_v26 }
 0x24b   :  { %5098 = vmatpush3.bf16.msra.mxu1 %v6163_v27  ;;  %5035 = vmatprep.subr.bf16.mxu0 %v6164_v31 }
 0x24c   :  { %3719 = vmatmul.mubr.bf16.gmra.mrb[36].mxu0 %v6534_v44  ;;  %5099 = vmatprep.subr.bf16.mxu1 %v6166_v63 }
 0x24d   :  { %3945 = vmatmul.mubr.bf16.gmra.mrb[36].mxu1 %v6534_v44  ;;  %3728 = vmatprep.mubr.bf16.mxu0 %v6548_v21  ;;  %v6174_v44 = vld [vmem:[%s6895_s5 + $0xe0] sm:$0xff]  }
 0x24e   :  { %3954 = vmatprep.mubr.bf16.mxu1 %v6548_v21  ;;  %5036 = vmatpush3.bf16.msra.mxu0 %v6165_v46  ;;  %v6173_v21 = vld [vmem:[%s6895_s5 + $0x20] sm:$0xff]  }
 0x24f   :  { %5100 = vmatpush3.bf16.msra.mxu1 %v6167_v38  ;;  %5037 = vmatprep.subr.bf16.mxu0 %v6168_v40 }
 0x250   :  { %5101 = vmatprep.subr.bf16.mxu1 %v6170_v42 }
 0x252   :  { %5038 = vmatpush3.bf16.msra.mxu0 %v6169_v43 }
 0x253   :  { %5102 = vmatpush3.bf16.msra.mxu1 %v6171_v45  ;;  %5039 = vmatprep.subr.bf16.mxu0 %v6172_v47 }
 0x254   :  { %3729 = vmatmul.mubr.bf16.gmra.mrb[40].mxu0 %v6546_v19  ;;  %5103 = vmatprep.subr.bf16.mxu1 %v6174_v44 }
 0x255   :  { %3955 = vmatmul.mubr.bf16.gmra.mrb[40].mxu1 %v6546_v19  ;;  %3738 = vmatprep.mubr.bf16.mxu0 %v6560_v5  ;;  %v6182_v19 = vld [vmem:[%s6895_s5 + $0xf0] sm:$0xff]  }
 0x256   :  { %3964 = vmatprep.mubr.bf16.mxu1 %v6560_v5  ;;  %5040 = vmatpush3.bf16.msra.mxu0 %v6173_v21  ;;  %v6181_v5 = vld [vmem:[%s6895_s5 + $0x30] sm:$0xff]  }
 0x257   :  { %5104 = vmatpush3.bf16.msra.mxu1 %v6175_v48  ;;  %5041 = vmatprep.subr.bf16.mxu0 %v6176_v49 }
 0x258   :  { %5105 = vmatprep.subr.bf16.mxu1 %v6178_v50 }
 0x25a   :  { %5042 = vmatpush3.bf16.msra.mxu0 %v6177_v51 }
 0x25b   :  { %5106 = vmatpush3.bf16.msra.mxu1 %v6179_v53  ;;  %5043 = vmatprep.subr.bf16.mxu0 %v6180_v55 }
 0x25c   :  { %3739 = vmatmul.mubr.bf16.gmra.mrb[44].mxu0 %v6558_v3  ;;  %5107 = vmatprep.subr.bf16.mxu1 %v6182_v19 }
 0x25d   :  { %3965 = vmatmul.mubr.bf16.gmra.mrb[44].mxu1 %v6558_v3  ;;  %3748 = vmatprep.mubr.bf16.mxu0 %v6572_v54  ;;  %v6184_v3 = vld [vmem:[%s6895_s5 + $0x78] sm:$0xff]  }
 0x25e   :  { %3974 = vmatprep.mubr.bf16.mxu1 %v6572_v54  ;;  %5044 = vmatpush3.bf16.msra.mxu0 %v6181_v5  ;;  %v6185_v54 = vld [vmem:[%s6895_s5 + $0x38] sm:$0xff]  }
 0x25f   :  { %5108 = vmatpush3.bf16.msra.mxu1 %v6183_v56  ;;  %5045 = vmatprep.subr.bf16.mxu0 %v6184_v3 }
 0x262   :  { %5046 = vmatpush3.bf16.msra.mxu0 %v6185_v54 }
 0x264   :  { %3749 = vmatmul.mubr.bf16.gmra.mrb[48].mxu0 %v6570_v52 }
 0x265   :  { %3975 = vmatmul.mubr.bf16.gmra.mrb[48].mxu1 %v6570_v52  ;;  %3758 = vmatprep.mubr.bf16.mxu0 %v6584_v41  ;;  %v6186_v52 = vld [vmem:[%s6895_s5 + $0xf8] sm:$0xff]  }
 0x266   :  { %3984 = vmatprep.mubr.bf16.mxu1 %v6584_v41  ;;  %5109 = vmatprep.subr.bf16.mxu1 %v6186_v52  ;;  %v2901_v41 = vld [vmem:[%s6894_s4] sm:$0xf] }
 0x267   :  { %v6751_v57 = vrot.slane %v2901_v41, %v351_v32  ;;  %v6755_v58 = vrot.slane %v2901_v41, %v359_v33 }
 0x26c   :  { %3759 = vmatmul.mubr.bf16.gmra.mrb[52].mxu0 %v6582_v39 }
 0x26d   :  { %3985 = vmatmul.mubr.bf16.gmra.mrb[52].mxu1 %v6582_v39  ;;  %3768 = vmatprep.mubr.bf16.mxu0 %v6596_v23  ;;  %v6187_v39 = vld [vmem:[%s6895_s5 + $0xb8] sm:$0xff]  }
 0x26e   :  { %3994 = vmatprep.mubr.bf16.mxu1 %v6596_v23  ;;  %5110 = vmatpush3.bf16.msra.mxu1 %v6187_v39  ;;  %v6747_v23 = vrot.slane %v2901_v41, %v355_v30 }
 0x274   :  { %3769 = vmatmul.mubr.bf16.gmra.mrb[56].mxu0 %v6594_v18 }
 0x275   :  { %3995 = vmatmul.mubr.bf16.gmra.mrb[56].mxu1 %v6594_v18  ;;  %3778 = vmatprep.mubr.bf16.mxu0 %v6608_v10  ;;  %v6743_v18 = vrot.slane %v2901_v41, %v347_v29 }
 0x276   :  { %4004 = vmatprep.mubr.bf16.mxu1 %v6608_v10 }
 0x27c   :  { %3779 = vmatmul.mubr.bf16.gmra.mrb[60].mxu0 %v6606_v36 }
 0x27d   :  { %4005 = vmatmul.mubr.bf16.gmra.mrb[60].mxu1 %v6606_v36 }
 0x317   :  { %v3710_v59 = vpop.f32.mrb[32].mxu0 }
 0x318   :  { %v5223_v60 = vadd.f32 %v3710_v59, %v6743_v18  ;;  %v3936_v61 = vpop.f32.mrb[32].mxu1  ;;  %v3712_v62 = vpop.f32.mrb[33].mxu0 }
 0x319   :  { %v5255_v29 = vadd.f32 %v3936_v61, %v6747_v23  ;;  %v5224_v0 = vadd.f32 %v3712_v62, %v6751_v57  ;;  %v3938_v2 = vpop.f32.mrb[33].mxu1  ;;  %v3714_v30 = vpop.f32.mrb[34].mxu0 }
 0x31a   :  { %v5256_v4 = vadd.f32 %v3938_v2, %v6755_v58  ;;  %v5225_v32 = vadd.f32 %v3714_v30, %v6743_v18  ;;  %v3940_v34 = vpop.f32.mrb[34].mxu1  ;;  %v3716_v35 = vpop.f32.mrb[35].mxu0  ;;  %v4015_v7 = vmax.f32 %v5223_v60, 0.0 }
 0x31b   :  { %v5257_v28 = vadd.f32 %v3940_v34, %v6747_v23  ;;  %v5226_v33 = vadd.f32 %v3716_v35, %v6751_v57  ;;  %v3942_v6 = vpop.f32.mrb[35].mxu1  ;;  %v4017_v36 = vmax.f32 %v5255_v29, 0.0  ;;  %v4016_v37 = vmax.f32 %v5224_v0, 0.0 }
 0x31c   :  { %v4019_v8 = vmax.f32 %v5225_v32, 0.0  ;;  %v5258_v9 = vadd.f32 %v3942_v6, %v6755_v58  ;;  %v4018_v12 = vmax.f32 %v5256_v4, 0.0 }
 0x31d   :  { %v4021_v10 = vmax.f32 %v5257_v28, 0.0  ;;  %v4020_v11 = vmax.f32 %v5226_v33, 0.0 }
 0x31e   :  { %v4079_v13 = vpack.c.bf16 %v4019_v8, %v4015_v7  ;;  %v4022_v14 = vmax.f32 %v5258_v9, 0.0 }
 0x31f   :  { %v4081_v15 = vpack.c.bf16 %v4021_v10, %v4017_v36  ;;  %v4080_v16 = vpack.c.bf16 %v4020_v11, %v4016_v37  ;;  %v3720_v17 = vpop.f32.mrb[36].mxu0 }
 0x320   :  { %v4082_v20 = vpack.c.bf16 %v4022_v14, %v4018_v12  ;;  %v5227_v22 = vadd.f32 %v3720_v17, %v6743_v18  ;;  %v3946_v1 = vpop.f32.mrb[36].mxu1  ;;  %v3722_v24 = vpop.f32.mrb[37].mxu0 }
 0x321   :  { %v5259_v25 = vadd.f32 %v3946_v1, %v6747_v23  ;;  %v5228_v26 = vadd.f32 %v3722_v24, %v6751_v57  ;;  %v3948_v27 = vpop.f32.mrb[37].mxu1  ;;  %v3724_v31 = vpop.f32.mrb[38].mxu0  ;;  %4406 = vmatprep.mubr.bf16.mxu0 %v4080_v16 }
 0x322   :  { %v5260_v63 = vadd.f32 %v3948_v27, %v6755_v58  ;;  %v5229_v46 = vadd.f32 %v3724_v31, %v6743_v18  ;;  %v3950_v38 = vpop.f32.mrb[38].mxu1  ;;  %4503 = vmatprep.mubr.bf16.mxu1 %v4082_v20  ;;  %v3726_v40 = vpop.f32.mrb[39].mxu0  ;;  %4407 = vmatmul.mubr.bf16.vlgmr.msra.gmra.mrb[64].mxu0 %v4079_v13  ;;  %v4023_v47 = vmax.f32 %v5227_v22, 0.0 }
 0x323   :  { %v5261_v42 = vadd.f32 %v3950_v38, %v6747_v23  ;;  %v5230_v43 = vadd.f32 %v3726_v40, %v6751_v57  ;;  %v3952_v45 = vpop.f32.mrb[39].mxu1  ;;  %4504 = vmatmul.mubr.bf16.vlgmr.msra.gmra.mrb[64].mxu1 %v4081_v15  ;;  %v4025_v48 = vmax.f32 %v5259_v25, 0.0  ;;  %v4024_v49 = vmax.f32 %v5228_v26, 0.0 }
 0x324   :  { %v4027_v44 = vmax.f32 %v5229_v46, 0.0  ;;  %v5262_v21 = vadd.f32 %v3952_v45, %v6755_v58  ;;  %v4026_v53 = vmax.f32 %v5260_v63, 0.0 }
 0x325   :  { %v4029_v50 = vmax.f32 %v5261_v42, 0.0  ;;  %v4028_v51 = vmax.f32 %v5230_v43, 0.0 }
 0x326   :  { %v4083_v55 = vpack.c.bf16 %v4027_v44, %v4023_v47  ;;  %v4030_v19 = vmax.f32 %v5262_v21, 0.0 }
 0x327   :  { %v4085_v5 = vpack.c.bf16 %v4029_v50, %v4025_v48  ;;  %v4084_v56 = vpack.c.bf16 %v4028_v51, %v4024_v49  ;;  %v3730_v3 = vpop.f32.mrb[40].mxu0 }
 0x328   :  { %v4086_v52 = vpack.c.bf16 %v4030_v19, %v4026_v53  ;;  %v5231_v54 = vadd.f32 %v3730_v3, %v6743_v18  ;;  %v3956_v39 = vpop.f32.mrb[40].mxu1  ;;  %v3732_v41 = vpop.f32.mrb[41].mxu0 }
 0x329   :  { %v5263_v59 = vadd.f32 %v3956_v39, %v6747_v23  ;;  %v5232_v60 = vadd.f32 %v3732_v41, %v6751_v57  ;;  %v3958_v61 = vpop.f32.mrb[41].mxu1  ;;  %v3734_v62 = vpop.f32.mrb[42].mxu0  ;;  %4414 = vmatprep.mubr.bf16.mxu0 %v4084_v56 }
 0x32a   :  { %v5264_v29 = vadd.f32 %v3958_v61, %v6755_v58  ;;  %v5233_v0 = vadd.f32 %v3734_v62, %v6743_v18  ;;  %v3960_v2 = vpop.f32.mrb[42].mxu1  ;;  %4511 = vmatprep.mubr.bf16.mxu1 %v4086_v52  ;;  %v3736_v30 = vpop.f32.mrb[43].mxu0  ;;  %4415 = vmatmul.mubr.bf16.gmra.mrb[68].mxu0 %v4083_v55  ;;  %v4031_v35 = vmax.f32 %v5231_v54, 0.0 }
 0x32b   :  { %v5265_v4 = vadd.f32 %v3960_v2, %v6747_v23  ;;  %v5234_v32 = vadd.f32 %v3736_v30, %v6751_v57  ;;  %v3962_v34 = vpop.f32.mrb[43].mxu1  ;;  %4512 = vmatmul.mubr.bf16.gmra.mrb[68].mxu1 %v4085_v5  ;;  %v4033_v6 = vmax.f32 %v5263_v59, 0.0  ;;  %v4032_v7 = vmax.f32 %v5232_v60, 0.0 }
 0x32c   :  { %v4035_v28 = vmax.f32 %v5233_v0, 0.0  ;;  %v5266_v33 = vadd.f32 %v3962_v34, %v6755_v58  ;;  %v4034_v36 = vmax.f32 %v5264_v29, 0.0 }
 0x32d   :  { %v4037_v8 = vmax.f32 %v5265_v4, 0.0  ;;  %v4036_v9 = vmax.f32 %v5234_v32, 0.0 }
 0x32e   :  { %v4087_v37 = vpack.c.bf16 %v4035_v28, %v4031_v35  ;;  %v4038_v10 = vmax.f32 %v5266_v33, 0.0 }
 0x32f   :  { %v4089_v11 = vpack.c.bf16 %v4037_v8, %v4033_v6  ;;  %v4088_v12 = vpack.c.bf16 %v4036_v9, %v4032_v7  ;;  %v3740_v13 = vpop.f32.mrb[44].mxu0 }
 0x330   :  { %v4090_v14 = vpack.c.bf16 %v4038_v10, %v4034_v36  ;;  %v5235_v15 = vadd.f32 %v3740_v13, %v6743_v18  ;;  %v3966_v16 = vpop.f32.mrb[44].mxu1  ;;  %v3742_v17 = vpop.f32.mrb[45].mxu0 }
 0x331   :  { %v5267_v20 = vadd.f32 %v3966_v16, %v6747_v23  ;;  %v5236_v22 = vadd.f32 %v3742_v17, %v6751_v57  ;;  %v3968_v1 = vpop.f32.mrb[45].mxu1  ;;  %v3744_v24 = vpop.f32.mrb[46].mxu0  ;;  %4422 = vmatprep.mubr.bf16.mxu0 %v4088_v12 }
 0x332   :  { %v5268_v25 = vadd.f32 %v3968_v1, %v6755_v58  ;;  %v5237_v26 = vadd.f32 %v3744_v24, %v6743_v18  ;;  %v3970_v27 = vpop.f32.mrb[46].mxu1  ;;  %4519 = vmatprep.mubr.bf16.mxu1 %v4090_v14  ;;  %v3746_v31 = vpop.f32.mrb[47].mxu0  ;;  %4423 = vmatmul.mubr.bf16.gmra.mrb[72].mxu0 %v4087_v37  ;;  %v4039_v40 = vmax.f32 %v5235_v15, 0.0 }
 0x333   :  { %v5269_v63 = vadd.f32 %v3970_v27, %v6747_v23  ;;  %v5238_v46 = vadd.f32 %v3746_v31, %v6751_v57  ;;  %v3972_v38 = vpop.f32.mrb[47].mxu1  ;;  %4520 = vmatmul.mubr.bf16.gmra.mrb[72].mxu1 %v4089_v11  ;;  %v4041_v45 = vmax.f32 %v5267_v20, 0.0  ;;  %v4040_v47 = vmax.f32 %v5236_v22, 0.0 }
 0x334   :  { %v4043_v42 = vmax.f32 %v5237_v26, 0.0  ;;  %v5270_v43 = vadd.f32 %v3972_v38, %v6755_v58  ;;  %v4042_v48 = vmax.f32 %v5268_v25, 0.0 }
 0x335   :  { %v4045_v44 = vmax.f32 %v5269_v63, 0.0  ;;  %v4044_v21 = vmax.f32 %v5238_v46, 0.0 }
 0x336   :  { %v4091_v49 = vpack.c.bf16 %v4043_v42, %v4039_v40  ;;  %v4046_v50 = vmax.f32 %v5270_v43, 0.0 }
 0x337   :  { %v4093_v51 = vpack.c.bf16 %v4045_v44, %v4041_v45  ;;  %v4092_v53 = vpack.c.bf16 %v4044_v21, %v4040_v47  ;;  %v3750_v55 = vpop.f32.mrb[48].mxu0 }
 0x338   :  { %v4094_v19 = vpack.c.bf16 %v4046_v50, %v4042_v48  ;;  %v5239_v5 = vadd.f32 %v3750_v55, %v6743_v18  ;;  %v3976_v56 = vpop.f32.mrb[48].mxu1  ;;  %v3752_v3 = vpop.f32.mrb[49].mxu0 }
 0x339   :  { %v5271_v52 = vadd.f32 %v3976_v56, %v6747_v23  ;;  %v5240_v54 = vadd.f32 %v3752_v3, %v6751_v57  ;;  %v3978_v39 = vpop.f32.mrb[49].mxu1  ;;  %v3754_v41 = vpop.f32.mrb[50].mxu0  ;;  %4430 = vmatprep.mubr.bf16.mxu0 %v4092_v53 }
 0x33a   :  { %v5272_v59 = vadd.f32 %v3978_v39, %v6755_v58  ;;  %v5241_v60 = vadd.f32 %v3754_v41, %v6743_v18  ;;  %v3980_v61 = vpop.f32.mrb[50].mxu1  ;;  %4527 = vmatprep.mubr.bf16.mxu1 %v4094_v19  ;;  %v3756_v62 = vpop.f32.mrb[51].mxu0  ;;  %4431 = vmatmul.mubr.bf16.gmra.mrb[76].mxu0 %v4091_v49  ;;  %v4047_v30 = vmax.f32 %v5239_v5, 0.0 }
 0x33b   :  { %v5273_v29 = vadd.f32 %v3980_v61, %v6747_v23  ;;  %v5242_v0 = vadd.f32 %v3756_v62, %v6751_v57  ;;  %v3982_v2 = vpop.f32.mrb[51].mxu1  ;;  %4528 = vmatmul.mubr.bf16.gmra.mrb[76].mxu1 %v4093_v51  ;;  %v4049_v34 = vmax.f32 %v5271_v52, 0.0  ;;  %v4048_v35 = vmax.f32 %v5240_v54, 0.0 }
 0x33c   :  { %v4051_v4 = vmax.f32 %v5241_v60, 0.0  ;;  %v5274_v32 = vadd.f32 %v3982_v2, %v6755_v58  ;;  %v4050_v6 = vmax.f32 %v5272_v59, 0.0 }
 0x33d   :  { %v4053_v28 = vmax.f32 %v5273_v29, 0.0  ;;  %v4052_v33 = vmax.f32 %v5242_v0, 0.0 }
 0x33e   :  { %v4095_v7 = vpack.c.bf16 %v4051_v4, %v4047_v30  ;;  %v4054_v8 = vmax.f32 %v5274_v32, 0.0 }
 0x33f   :  { %v4097_v9 = vpack.c.bf16 %v4053_v28, %v4049_v34  ;;  %v4096_v36 = vpack.c.bf16 %v4052_v33, %v4048_v35  ;;  %v3760_v37 = vpop.f32.mrb[52].mxu0 }
 0x340   :  { %v4098_v10 = vpack.c.bf16 %v4054_v8, %v4050_v6  ;;  %v5243_v11 = vadd.f32 %v3760_v37, %v6743_v18  ;;  %v3986_v12 = vpop.f32.mrb[52].mxu1  ;;  %v3762_v13 = vpop.f32.mrb[53].mxu0 }
 0x341   :  { %v5275_v14 = vadd.f32 %v3986_v12, %v6747_v23  ;;  %v5244_v15 = vadd.f32 %v3762_v13, %v6751_v57  ;;  %v3988_v16 = vpop.f32.mrb[53].mxu1  ;;  %v3764_v17 = vpop.f32.mrb[54].mxu0  ;;  %4438 = vmatprep.mubr.bf16.mxu0 %v4096_v36 }
 0x342   :  { %v5276_v20 = vadd.f32 %v3988_v16, %v6755_v58  ;;  %v5245_v22 = vadd.f32 %v3764_v17, %v6743_v18  ;;  %v3990_v1 = vpop.f32.mrb[54].mxu1  ;;  %4535 = vmatprep.mubr.bf16.mxu1 %v4098_v10  ;;  %v3766_v24 = vpop.f32.mrb[55].mxu0  ;;  %4439 = vmatmul.mubr.bf16.gmra.mrb[80].mxu0 %v4095_v7  ;;  %v4055_v31 = vmax.f32 %v5243_v11, 0.0 }
 0x343   :  { %v5277_v25 = vadd.f32 %v3990_v1, %v6747_v23  ;;  %v5246_v26 = vadd.f32 %v3766_v24, %v6751_v57  ;;  %v3992_v27 = vpop.f32.mrb[55].mxu1  ;;  %4536 = vmatmul.mubr.bf16.gmra.mrb[80].mxu1 %v4097_v9  ;;  %v4057_v38 = vmax.f32 %v5275_v14, 0.0  ;;  %v4056_v40 = vmax.f32 %v5244_v15, 0.0 }
 0x344   :  { %v4059_v63 = vmax.f32 %v5245_v22, 0.0  ;;  %v5278_v46 = vadd.f32 %v3992_v27, %v6755_v58  ;;  %v4058_v45 = vmax.f32 %v5276_v20, 0.0 }
 0x345   :  { %v4061_v42 = vmax.f32 %v5277_v25, 0.0  ;;  %v4060_v43 = vmax.f32 %v5246_v26, 0.0 }
 0x346   :  { %v4099_v47 = vpack.c.bf16 %v4059_v63, %v4055_v31  ;;  %v4062_v44 = vmax.f32 %v5278_v46, 0.0 }
 0x347   :  { %v4101_v21 = vpack.c.bf16 %v4061_v42, %v4057_v38  ;;  %v4100_v48 = vpack.c.bf16 %v4060_v43, %v4056_v40  ;;  %v3770_v49 = vpop.f32.mrb[56].mxu0 }
 0x348   :  { %v4102_v50 = vpack.c.bf16 %v4062_v44, %v4058_v45  ;;  %v5247_v51 = vadd.f32 %v3770_v49, %v6743_v18  ;;  %v3996_v53 = vpop.f32.mrb[56].mxu1  ;;  %v3772_v55 = vpop.f32.mrb[57].mxu0 }
 0x349   :  { %v5279_v19 = vadd.f32 %v3996_v53, %v6747_v23  ;;  %v5248_v5 = vadd.f32 %v3772_v55, %v6751_v57  ;;  %v3998_v56 = vpop.f32.mrb[57].mxu1  ;;  %v3774_v3 = vpop.f32.mrb[58].mxu0  ;;  %4446 = vmatprep.mubr.bf16.mxu0 %v4100_v48 }
 0x34a   :  { %v5280_v52 = vadd.f32 %v3998_v56, %v6755_v58  ;;  %v5249_v54 = vadd.f32 %v3774_v3, %v6743_v18  ;;  %v4000_v39 = vpop.f32.mrb[58].mxu1  ;;  %4543 = vmatprep.mubr.bf16.mxu1 %v4102_v50  ;;  %v3776_v41 = vpop.f32.mrb[59].mxu0  ;;  %4447 = vmatmul.mubr.bf16.gmra.mrb[84].mxu0 %v4099_v47  ;;  %v4063_v62 = vmax.f32 %v5247_v51, 0.0 }
 0x34b   :  { %v5281_v59 = vadd.f32 %v4000_v39, %v6747_v23  ;;  %v5250_v60 = vadd.f32 %v3776_v41, %v6751_v57  ;;  %v4002_v61 = vpop.f32.mrb[59].mxu1  ;;  %4544 = vmatmul.mubr.bf16.gmra.mrb[84].mxu1 %v4101_v21  ;;  %v4065_v2 = vmax.f32 %v5279_v19, 0.0  ;;  %v4064_v30 = vmax.f32 %v5248_v5, 0.0 }
 0x34c   :  { %v4067_v29 = vmax.f32 %v5249_v54, 0.0  ;;  %v5282_v0 = vadd.f32 %v4002_v61, %v6755_v58  ;;  %v4066_v34 = vmax.f32 %v5280_v52, 0.0 }
 0x34d   :  { %v4069_v4 = vmax.f32 %v5281_v59, 0.0  ;;  %v4068_v32 = vmax.f32 %v5250_v60, 0.0 }
 0x34e   :  { %v4103_v35 = vpack.c.bf16 %v4067_v29, %v4063_v62  ;;  %v4070_v28 = vmax.f32 %v5282_v0, 0.0 }
 0x34f   :  { %v4105_v33 = vpack.c.bf16 %v4069_v4, %v4065_v2  ;;  %v4104_v6 = vpack.c.bf16 %v4068_v32, %v4064_v30  ;;  %v3780_v7 = vpop.f32.mrb[60].mxu0 }
 0x350   :  { %v4106_v8 = vpack.c.bf16 %v4070_v28, %v4066_v34  ;;  %v5251_v9 = vadd.f32 %v3780_v7, %v6743_v18  ;;  %v4006_v36 = vpop.f32.mrb[60].mxu1  ;;  %v3782_v37 = vpop.f32.mrb[61].mxu0 }
 0x351   :  { %v5283_v10 = vadd.f32 %v4006_v36, %v6747_v23  ;;  %v5252_v11 = vadd.f32 %v3782_v37, %v6751_v57  ;;  %v4008_v12 = vpop.f32.mrb[61].mxu1  ;;  %v3784_v13 = vpop.f32.mrb[62].mxu0  ;;  %4454 = vmatprep.mubr.bf16.mxu0 %v4104_v6 }
 0x352   :  { %v5284_v14 = vadd.f32 %v4008_v12, %v6755_v58  ;;  %v5253_v15 = vadd.f32 %v3784_v13, %v6743_v18  ;;  %v4010_v16 = vpop.f32.mrb[62].mxu1  ;;  %4551 = vmatprep.mubr.bf16.mxu1 %v4106_v8  ;;  %v3786_v17 = vpop.f32.mrb[63].mxu0  ;;  %4455 = vmatmul.mubr.bf16.gmra.mrb[88].mxu0 %v4103_v35  ;;  %v4071_v24 = vmax.f32 %v5251_v9, 0.0 }
 0x353   :  { %v5285_v20 = vadd.f32 %v4010_v16, %v6747_v23  ;;  %v5254_v22 = vadd.f32 %v3786_v17, %v6751_v57  ;;  %v4012_v1 = vpop.f32.mrb[63].mxu1  ;;  %4552 = vmatmul.mubr.bf16.gmra.mrb[88].mxu1 %v4105_v33  ;;  %v4073_v27 = vmax.f32 %v5283_v10, 0.0  ;;  %v4072_v31 = vmax.f32 %v5252_v11, 0.0 }
 0x354   :  { %v4075_v25 = vmax.f32 %v5253_v15, 0.0  ;;  %v5286_v26 = vadd.f32 %v4012_v1, %v6755_v58  ;;  %v4074_v38 = vmax.f32 %v5284_v14, 0.0  ;;  %v6824_v58 = vld [vmem:[%s6896_s6] ss:$0 sm:$0xff] }
 0x355   :  { %v4077_v63 = vmax.f32 %v5285_v20, 0.0  ;;  %v4076_v46 = vmax.f32 %v5254_v22, 0.0 }
 0x356   :  { %v4107_v18 = vpack.c.bf16 %v4075_v25, %v4071_v24  ;;  %v4078_v40 = vmax.f32 %v5286_v26, 0.0 }
 0x357   :  { %v4109_v42 = vpack.c.bf16 %v4077_v63, %v4073_v27  ;;  %v4108_v43 = vpack.c.bf16 %v4076_v46, %v4072_v31 }
 0x358   :  { %v4110_v45 = vpack.c.bf16 %v4078_v40, %v4074_v38 }
 0x359   :  { %4462 = vmatprep.mubr.bf16.mxu0 %v4108_v43 }
 0x35a   :  { %4559 = vmatprep.mubr.bf16.mxu1 %v4110_v45  ;;  %4463 = vmatmul.mubr.bf16.gmra.mrb[92].mxu0 %v4107_v18 }
 0x35b   :  { %4560 = vmatmul.mubr.bf16.gmra.mrb[92].mxu1 %v4109_v42 }
 0x3f5   :  { %v5047_v23 = vpop.f32.mrb[64].mxu0 }
 0x3f6   :  { %v5111_v57 = vpop.f32.mrb[64].mxu1  ;;  %v5048_v47 = vpop.f32.mrb[65].mxu0 }
 0x3f7   :  { %v5049_v44 = vadd.f32 %v5048_v47, %v5047_v23  ;;  %v5112_v21 = vpop.f32.mrb[65].mxu1  ;;  %v5050_v48 = vpop.f32.mrb[66].mxu0 }
 0x3f8   :  { %v5113_v49 = vadd.f32 %v5112_v21, %v5111_v57  ;;  %v5114_v50 = vpop.f32.mrb[66].mxu1  ;;  %v5051_v51 = vpop.f32.mrb[67].mxu0 }
 0x3f9   :  { %v4409_v53 = vadd.f32 %v5049_v44, %v6824_v58  ;;  %v5052_v55 = vadd.f32 %v5051_v51, %v5050_v48  ;;  %v5115_v19 = vpop.f32.mrb[67].mxu1 }
 0x3fa   :  { %v5116_v5 = vadd.f32 %v5115_v19, %v5114_v50 }
 0x3fb   :  { %v4506_v56 = vadd.f32 %v5113_v49, %v4409_v53  ;;  %v4412_v3 = vadd.f32 %v5052_v55, %v6824_v58 }
 0x3fd   :  { %4568 = vst [vmem:[%s6897_s7] sm:$0xff] %v4506_v56  ;;  %v4509_v52 = vadd.f32 %v5116_v5, %v4412_v3  ;;  %v5053_v54 = vpop.f32.mrb[68].mxu0 }
 0x3fe   :  { %v5117_v39 = vpop.f32.mrb[68].mxu1  ;;  %v5054_v41 = vpop.f32.mrb[69].mxu0 }
 0x3ff   :  { %4569 = vst [vmem:[%s6897_s7 + $0x8] sm:$0xff] %v4509_v52  ;;  %v5055_v59 = vadd.f32 %v5054_v41, %v5053_v54  ;;  %v5118_v60 = vpop.f32.mrb[69].mxu1  ;;  %v5056_v61 = vpop.f32.mrb[70].mxu0 }
 0x400   :  { %v5119_v62 = vadd.f32 %v5118_v60, %v5117_v39  ;;  %v5120_v29 = vpop.f32.mrb[70].mxu1  ;;  %v5057_v0 = vpop.f32.mrb[71].mxu0 }
 0x401   :  { %v4417_v2 = vadd.f32 %v5055_v59, %v6824_v58  ;;  %v5058_v30 = vadd.f32 %v5057_v0, %v5056_v61  ;;  %v5121_v4 = vpop.f32.mrb[71].mxu1 }
 0x402   :  { %v5122_v32 = vadd.f32 %v5121_v4, %v5120_v29 }
 0x403   :  { %v4514_v34 = vadd.f32 %v5119_v62, %v4417_v2  ;;  %v4420_v35 = vadd.f32 %v5058_v30, %v6824_v58 }
 0x405   :  { %4570 = vst [vmem:[%s6897_s7 + $0x10] sm:$0xff] %v4514_v34  ;;  %v4517_v28 = vadd.f32 %v5122_v32, %v4420_v35  ;;  %v5059_v33 = vpop.f32.mrb[72].mxu0 }
 0x406   :  { %v5123_v6 = vpop.f32.mrb[72].mxu1  ;;  %v5060_v7 = vpop.f32.mrb[73].mxu0 }
 0x407   :  { %4571 = vst [vmem:[%s6897_s7 + $0x18] sm:$0xff] %v4517_v28  ;;  %v5061_v8 = vadd.f32 %v5060_v7, %v5059_v33  ;;  %v5124_v9 = vpop.f32.mrb[73].mxu1  ;;  %v5062_v36 = vpop.f32.mrb[74].mxu0 }
 0x408   :  { %v5125_v37 = vadd.f32 %v5124_v9, %v5123_v6  ;;  %v5126_v10 = vpop.f32.mrb[74].mxu1  ;;  %v5063_v11 = vpop.f32.mrb[75].mxu0 }
 0x409   :  { %v4425_v12 = vadd.f32 %v5061_v8, %v6824_v58  ;;  %v5064_v13 = vadd.f32 %v5063_v11, %v5062_v36  ;;  %v5127_v14 = vpop.f32.mrb[75].mxu1 }
 0x40a   :  { %v5128_v15 = vadd.f32 %v5127_v14, %v5126_v10 }
 0x40b   :  { %v4522_v16 = vadd.f32 %v5125_v37, %v4425_v12  ;;  %v4428_v17 = vadd.f32 %v5064_v13, %v6824_v58 }
 0x40d   :  { %4572 = vst [vmem:[%s6897_s7 + $0x20] sm:$0xff] %v4522_v16  ;;  %v4525_v20 = vadd.f32 %v5128_v15, %v4428_v17  ;;  %v5065_v22 = vpop.f32.mrb[76].mxu0 }
 0x40e   :  { %v5129_v1 = vpop.f32.mrb[76].mxu1  ;;  %v5066_v24 = vpop.f32.mrb[77].mxu0 }
 0x40f   :  { %4573 = vst [vmem:[%s6897_s7 + $0x28] sm:$0xff] %v4525_v20  ;;  %v5067_v25 = vadd.f32 %v5066_v24, %v5065_v22  ;;  %v5130_v26 = vpop.f32.mrb[77].mxu1  ;;  %v5068_v27 = vpop.f32.mrb[78].mxu0 }
 0x410   :  { %v5131_v31 = vadd.f32 %v5130_v26, %v5129_v1  ;;  %v5132_v63 = vpop.f32.mrb[78].mxu1  ;;  %v5069_v46 = vpop.f32.mrb[79].mxu0 }
 0x411   :  { %v4433_v38 = vadd.f32 %v5067_v25, %v6824_v58  ;;  %v5070_v18 = vadd.f32 %v5069_v46, %v5068_v27  ;;  %v5133_v40 = vpop.f32.mrb[79].mxu1 }
 0x412   :  { %v5134_v42 = vadd.f32 %v5133_v40, %v5132_v63 }
 0x413   :  { %v4530_v43 = vadd.f32 %v5131_v31, %v4433_v38  ;;  %v4436_v45 = vadd.f32 %v5070_v18, %v6824_v58 }
 0x415   :  { %4574 = vst [vmem:[%s6897_s7 + $0x30] sm:$0xff] %v4530_v43  ;;  %v4533_v23 = vadd.f32 %v5134_v42, %v4436_v45  ;;  %v5071_v57 = vpop.f32.mrb[80].mxu0 }
 0x416   :  { %v5135_v47 = vpop.f32.mrb[80].mxu1  ;;  %v5072_v44 = vpop.f32.mrb[81].mxu0 }
 0x417   :  { %4575 = vst [vmem:[%s6897_s7 + $0x38] sm:$0xff] %v4533_v23  ;;  %v5073_v21 = vadd.f32 %v5072_v44, %v5071_v57  ;;  %v5136_v48 = vpop.f32.mrb[81].mxu1  ;;  %v5074_v49 = vpop.f32.mrb[82].mxu0 }
 0x418   :  { %v5137_v50 = vadd.f32 %v5136_v48, %v5135_v47  ;;  %v5138_v51 = vpop.f32.mrb[82].mxu1  ;;  %v5075_v53 = vpop.f32.mrb[83].mxu0 }
 0x419   :  { %v4441_v55 = vadd.f32 %v5073_v21, %v6824_v58  ;;  %v5076_v19 = vadd.f32 %v5075_v53, %v5074_v49  ;;  %v5139_v5 = vpop.f32.mrb[83].mxu1 }
 0x41a   :  { %v5140_v56 = vadd.f32 %v5139_v5, %v5138_v51 }
 0x41b   :  { %v4538_v3 = vadd.f32 %v5137_v50, %v4441_v55  ;;  %v4444_v52 = vadd.f32 %v5076_v19, %v6824_v58 }
 0x41d   :  { %4576 = vst [vmem:[%s6897_s7 + $0x40] sm:$0xff] %v4538_v3  ;;  %v4541_v54 = vadd.f32 %v5140_v56, %v4444_v52  ;;  %v5077_v39 = vpop.f32.mrb[84].mxu0 }
 0x41e   :  { %v5141_v41 = vpop.f32.mrb[84].mxu1  ;;  %v5078_v59 = vpop.f32.mrb[85].mxu0 }
 0x41f   :  { %4577 = vst [vmem:[%s6897_s7 + $0x48] sm:$0xff] %v4541_v54  ;;  %v5079_v60 = vadd.f32 %v5078_v59, %v5077_v39  ;;  %v5142_v61 = vpop.f32.mrb[85].mxu1  ;;  %v5080_v62 = vpop.f32.mrb[86].mxu0 }
 0x420   :  { %v5143_v29 = vadd.f32 %v5142_v61, %v5141_v41  ;;  %v5144_v0 = vpop.f32.mrb[86].mxu1  ;;  %v5081_v2 = vpop.f32.mrb[87].mxu0 }
 0x421   :  { %v4449_v30 = vadd.f32 %v5079_v60, %v6824_v58  ;;  %v5082_v4 = vadd.f32 %v5081_v2, %v5080_v62  ;;  %v5145_v32 = vpop.f32.mrb[87].mxu1 }
 0x422   :  { %v5146_v34 = vadd.f32 %v5145_v32, %v5144_v0 }
 0x423   :  { %v4546_v35 = vadd.f32 %v5143_v29, %v4449_v30  ;;  %v4452_v28 = vadd.f32 %v5082_v4, %v6824_v58 }
 0x425   :  { %4578 = vst [vmem:[%s6897_s7 + $0x50] sm:$0xff] %v4546_v35  ;;  %v4549_v33 = vadd.f32 %v5146_v34, %v4452_v28  ;;  %v5083_v6 = vpop.f32.mrb[88].mxu0 }
 0x426   :  { %v5147_v7 = vpop.f32.mrb[88].mxu1  ;;  %v5084_v8 = vpop.f32.mrb[89].mxu0 }
 0x427   :  { %4579 = vst [vmem:[%s6897_s7 + $0x58] sm:$0xff] %v4549_v33  ;;  %v5085_v9 = vadd.f32 %v5084_v8, %v5083_v6  ;;  %v5148_v36 = vpop.f32.mrb[89].mxu1  ;;  %v5086_v37 = vpop.f32.mrb[90].mxu0 }
 0x428   :  { %v5149_v10 = vadd.f32 %v5148_v36, %v5147_v7  ;;  %v5150_v11 = vpop.f32.mrb[90].mxu1  ;;  %v5087_v12 = vpop.f32.mrb[91].mxu0 }
 0x429   :  { %v4457_v13 = vadd.f32 %v5085_v9, %v6824_v58  ;;  %v5088_v14 = vadd.f32 %v5087_v12, %v5086_v37  ;;  %v5151_v15 = vpop.f32.mrb[91].mxu1 }
 0x42a   :  { %v5152_v16 = vadd.f32 %v5151_v15, %v5150_v11 }
 0x42b   :  { %v4554_v17 = vadd.f32 %v5149_v10, %v4457_v13  ;;  %v4460_v20 = vadd.f32 %v5088_v14, %v6824_v58 }
 0x42d   :  { %4580 = vst [vmem:[%s6897_s7 + $0x60] sm:$0xff] %v4554_v17  ;;  %v4557_v22 = vadd.f32 %v5152_v16, %v4460_v20  ;;  %v5089_v1 = vpop.f32.mrb[92].mxu0 }
 0x42e   :  { %v5153_v24 = vpop.f32.mrb[92].mxu1  ;;  %v5090_v25 = vpop.f32.mrb[93].mxu0 }
 0x42f   :  { %4581 = vst [vmem:[%s6897_s7 + $0x68] sm:$0xff] %v4557_v22  ;;  %v5091_v26 = vadd.f32 %v5090_v25, %v5089_v1  ;;  %v5154_v27 = vpop.f32.mrb[93].mxu1  ;;  %v5092_v31 = vpop.f32.mrb[94].mxu0 }
 0x430   :  { %v5155_v63 = vadd.f32 %v5154_v27, %v5153_v24  ;;  %v5156_v46 = vpop.f32.mrb[94].mxu1  ;;  %v5093_v38 = vpop.f32.mrb[95].mxu0 }
 0x431   :  { %v4465_v18 = vadd.f32 %v5091_v26, %v6824_v58  ;;  %v5094_v40 = vadd.f32 %v5093_v38, %v5092_v31  ;;  %v5157_v42 = vpop.f32.mrb[95].mxu1 }
 0x432   :  { %v5158_v43 = vadd.f32 %v5157_v42, %v5156_v46 }
 0x433   :  { %v4562_v45 = vadd.f32 %v5155_v63, %v4465_v18  ;;  %v4468_v23 = vadd.f32 %v5094_v40, %v6824_v58 }
 0x435   :  { %4582 = vst [vmem:[%s6897_s7 + $0x70] sm:$0xff] %v4562_v45  ;;  %v4565_v57 = vadd.f32 %v5158_v43, %v4468_v23 }
 0x437   :  { %4583 = vst [vmem:[%s6897_s7 + $0x78] sm:$0xff] %v4565_v57 }
 0x438   :  { %4588 = vsyncpa [#allocation3], 1 }
 0x439   :  { %4589 = vsyncpa [#allocation5], 1 }

</bundles_post_ra>
